<compile_context>
chip_gen: v7x
topology: tpu7x:2x2x1
jax: 0.10.0
libtpu: 0.0.40
codegen_flags: <defaults>
</compile_context>

<pallas_src>
import jax
import jax.numpy as jnp
from jax import lax
from jax.experimental import pallas as pl
from jax.experimental.pallas import tpu as pltpu

KH = KW = 3  # 3x3 conv, stride 1, pad 1


# ------------------------------ fused kernel --------------------------------

def fused_conv_gap_fc_kernel(x_ref, w_ref, bconv_ref, wfc_ref, bfc_ref, o_ref):
    """NB batch elements per grid step:
         conv3x3(pad=1) + bias -> ReLU -> global average pool -> fc -> logits

    x_ref     : (NB, H+2, W+2, Cin)  bf16  halo-padded input tile
    w_ref     : (9*Cin, Cout)        bf16  conv weights, (kh, kw, cin) flattened
    bconv_ref : (1, Cout)            f32
    wfc_ref   : (Cout, CPAD)         f32   fc weights, classes zero-padded to 128 lanes
    bfc_ref   : (1, CPAD)            f32
    o_ref     : (1, NB, CPAD)        f32   lane-dense logits slab
    """
    NB, Hp, Wp, cin = x_ref.shape
    H, W = Hp - 2, Wp - 2
    HW = H * W
    cout = w_ref.shape[1]

    # Single bf16 load of the whole tile; no per-tap casts.
    xb = x_ref[...]

    # Stage the 9 shifted halo windows ONCE into a (NB*HW, 9*Cin) patch matrix
    # (static slices; the dx=1,2 slices are sublane-misaligned so this relayout
    # happens here once instead of as 9 independent operand materializations).
    taps = [xb[:, dy:dy + H, dx:dx + W, :]
            for dy in range(KH) for dx in range(KW)]          # each (NB, H, W, Cin)
    patches = jnp.concatenate(taps, axis=-1).reshape(NB * HW, KH * KW * cin)

    # ONE bf16 MXU GEMM with K = 9*Cin, f32 accumulate. Feature map stays in VMEM.
    feat = jnp.dot(patches, w_ref[...],
                   preferred_element_type=jnp.float32)         # (NB*HW, Cout)
    feat = jnp.maximum(feat + bconv_ref[...], 0.0)             # bias + ReLU

    # Global average pool per batch element (HW % 8 == 0 -> layout-trivial split).
    pooled = jnp.sum(feat.reshape(NB, HW, cout), axis=1) * (1.0 / HW)   # (NB, Cout)

    # fc in f32 (tiny) producing a lane-dense (NB, CPAD) slab -> unmasked stores.
    o_ref[0] = jnp.dot(pooled, wfc_ref[...],
                       preferred_element_type=jnp.float32) + bfc_ref[...]


# --------------------------------- wrapper ----------------------------------

def _pick_batch_block(n, max_nb=8):
    """Largest divisor of n that is <= max_nb, keeping >= 2 grid steps when possible
    so v7x's two TensorCores both get work under dimension_semantics=("parallel",)."""
    nb = min(max_nb, n)
    while n % nb:
        nb -= 1
    if n // nb < 2 and nb > 1:
        nb //= 2
        while n % nb:
            nb -= 1
    return max(nb, 1)


def base_model_forward(x_nchw, params, *, max_batch_block=8):
    """Forward pass of the concrete BaseModel. Input is NCHW (PyTorch layout)."""
    N, cin, H, W = x_nchw.shape
    w_conv = params["w_conv"]                              # HWIO (3, 3, Cin, Cout)
    cout = w_conv.shape[-1]
    num_classes = params["w_fc"].shape[1]
    cpad = ((num_classes + 127) // 128) * 128              # lane-dense logits width

    nb = _pick_batch_block(N, max_batch_block)
    grid = N // nb

    # bf16 input in HBM (halves the x DMA) + 1-pixel halo pad; no im2col buffer.
    x_nhwc = jnp.transpose(x_nchw, (0, 2, 3, 1)).astype(jnp.bfloat16)
    xp = jnp.pad(x_nhwc, ((0, 0), (1, 1), (1, 1), (0, 0)))          # (N, H+2, W+2, Cin)

    # Single 2-D bf16 conv-weight operand for the K=9*Cin GEMM.
    w2d = w_conv.reshape(KH * KW * cin, cout).astype(jnp.bfloat16)   # (9*Cin, Cout)
    bconv = params["b_conv"].reshape(1, cout).astype(jnp.float32)
    # fc weight/bias zero-padded to 128 classes -> lane-dense output slab.
    wfc = jnp.zeros((cout, cpad), jnp.float32).at[:, :num_classes].set(
        params["w_fc"].astype(jnp.float32))
    bfc = jnp.zeros((1, cpad), jnp.float32).at[:, :num_classes].set(
        params["b_fc"].astype(jnp.float32))

    out = pl.pallas_call(
        fused_conv_gap_fc_kernel,
        out_shape=jax.ShapeDtypeStruct((grid, nb, cpad), jnp.float32),
        grid_spec=pltpu.PrefetchScalarGridSpec(
            num_scalar_prefetch=0,
            grid=(grid,),
            in_specs=[
                pl.BlockSpec((nb, H + 2, W + 2, cin), lambda g: (g, 0, 0, 0)),
                # constant-index weights/biases: DMA'd once, resident across grid steps
                pl.BlockSpec((KH * KW * cin, cout), lambda g: (0, 0)),
                pl.BlockSpec((1, cout), lambda g: (0, 0)),
                pl.BlockSpec((cout, cpad), lambda g: (0, 0)),
                pl.BlockSpec((1, cpad), lambda g: (0, 0)),
            ],
            out_specs=pl.BlockSpec((1, nb, cpad), lambda g: (g, 0, 0)),
        ),
        compiler_params=pltpu.CompilerParams(
            # batch-block axis -> megacore split on v7x; serial loop on v5e/v6e.
            dimension_semantics=("parallel",),
            # TODO(synk): set vmem_limit_bytes explicitly when scaling H*W*Cout
            # (v5e scoped default is 16 MiB vs 32 MiB on v6e/v7x).
        ),
    )(xp, w2d, bconv, wfc, bfc)

    return out.reshape(N, cpad)[:, :num_classes]


# -------------------------------- reference ---------------------------------

def reference_forward(x_nchw, params):
    """Pure-JAX reference: bf16-operand / f32-accumulate conv, f32 fc."""
    x = jnp.transpose(x_nchw, (0, 2, 3, 1)).astype(jnp.bfloat16)
    w = params["w_conv"].astype(jnp.bfloat16)
    y = lax.conv_general_dilated(
        x, w, window_strides=(1, 1), padding="SAME",
        dimension_numbers=("NHWC", "HWIO", "NHWC"),
        preferred_element_type=jnp.float32)
    y = jnp.maximum(y + params["b_conv"].astype(jnp.float32), 0.0)
    pooled = jnp.mean(y, axis=(1, 2))
    return pooled @ params["w_fc"] + params["b_fc"]


# ----------------------------------- main ------------------------------------

if __name__ == "__main__":
    num_classes = 10
    N, C_in, H, W = 2, 4, 16, 16
    C_hidden = 32

    key = jax.random.PRNGKey(0)
    k_x, k_wc, k_bc, k_wf, k_bf = jax.random.split(key, 5)

    x = jax.random.normal(k_x, (N, C_in, H, W), dtype=jnp.float32)
    params = {
        # conv weight in HWIO layout (kh, kw, Cin, Cout)
        "w_conv": 0.1 * jax.random.normal(k_wc, (3, 3, C_in, C_hidden), jnp.float32),
        "b_conv": 0.1 * jax.random.normal(k_bc, (C_hidden,), jnp.float32),
        "w_fc": 0.1 * jax.random.normal(k_wf, (C_hidden, num_classes), jnp.float32),
        "b_fc": 0.1 * jax.random.normal(k_bf, (num_classes,), jnp.float32),
    }

    out = jax.block_until_ready(base_model_forward(x, params))
    ref = jax.block_until_ready(reference_forward(x, params))

    assert out.shape == (N, num_classes)
    assert jnp.allclose(out, ref, atol=2e-3, rtol=2e-3), "mismatch vs reference"
    print("KERNEL_OK")
</pallas_src>

<mosaic_0001>
module attributes {stable_mosaic.version = 11 : i64} {
  func.func @fused_conv_gap_fc_kernel(%arg0: i32, %arg1: memref<1x18x18x4xbf16, #tpu.memory_space<vmem>>, %arg2: memref<36x32xbf16, #tpu.memory_space<vmem>>, %arg3: memref<1x32xf32, #tpu.memory_space<vmem>>, %arg4: memref<32x128xf32, #tpu.memory_space<vmem>>, %arg5: memref<1x128xf32, #tpu.memory_space<vmem>>, %arg6: memref<1x1x128xf32, #tpu.memory_space<vmem>>) attributes {dimension_semantics = [#tpu.dimension_semantics<parallel>], iteration_bounds = array<i64: 2>, scalar_prefetch = 0 : i64, scratch_operands = 0 : i64, tpu.core_type = #tpu.core_type<tc>, window_params = [{transform_indices = @transform_0, window_bounds = array<i64: 1, 18, 18, 4>}, {pipeline_mode = #tpu.pipeline_mode<synchronous>, transform_indices = @transform_1, window_bounds = array<i64: 36, 32>}, {pipeline_mode = #tpu.pipeline_mode<synchronous>, transform_indices = @transform_2, window_bounds = array<i64: 1, 32>}, {pipeline_mode = #tpu.pipeline_mode<synchronous>, transform_indices = @transform_3, window_bounds = array<i64: 32, 128>}, {pipeline_mode = #tpu.pipeline_mode<synchronous>, transform_indices = @transform_4, window_bounds = array<i64: 1, 128>}, {transform_indices = @transform_5, window_bounds = array<i64: 1, 1, 128>}]} {
    %c0 = arith.constant 0 : index
    %c0_0 = arith.constant 0 : index
    %c0_1 = arith.constant 0 : index
    %c0_2 = arith.constant 0 : index
    %0 = vector.load %arg1[%c0, %c0_0, %c0_1, %c0_2] : memref<1x18x18x4xbf16, #tpu.memory_space<vmem>>, vector<1x18x18x4xbf16>
    %1 = vector.extract_strided_slice %0 {offsets = [0, 0, 0, 0], sizes = [1, 16, 16, 4], strides = [1, 1, 1, 1]} : vector<1x18x18x4xbf16> to vector<1x16x16x4xbf16>
    %2 = vector.extract_strided_slice %0 {offsets = [0, 0, 1, 0], sizes = [1, 16, 16, 4], strides = [1, 1, 1, 1]} : vector<1x18x18x4xbf16> to vector<1x16x16x4xbf16>
    %3 = vector.extract_strided_slice %0 {offsets = [0, 0, 2, 0], sizes = [1, 16, 16, 4], strides = [1, 1, 1, 1]} : vector<1x18x18x4xbf16> to vector<1x16x16x4xbf16>
    %4 = vector.extract_strided_slice %0 {offsets = [0, 1, 0, 0], sizes = [1, 16, 16, 4], strides = [1, 1, 1, 1]} : vector<1x18x18x4xbf16> to vector<1x16x16x4xbf16>
    %5 = vector.extract_strided_slice %0 {offsets = [0, 1, 1, 0], sizes = [1, 16, 16, 4], strides = [1, 1, 1, 1]} : vector<1x18x18x4xbf16> to vector<1x16x16x4xbf16>
    %6 = vector.extract_strided_slice %0 {offsets = [0, 1, 2, 0], sizes = [1, 16, 16, 4], strides = [1, 1, 1, 1]} : vector<1x18x18x4xbf16> to vector<1x16x16x4xbf16>
    %7 = vector.extract_strided_slice %0 {offsets = [0, 2, 0, 0], sizes = [1, 16, 16, 4], strides = [1, 1, 1, 1]} : vector<1x18x18x4xbf16> to vector<1x16x16x4xbf16>
    %8 = vector.extract_strided_slice %0 {offsets = [0, 2, 1, 0], sizes = [1, 16, 16, 4], strides = [1, 1, 1, 1]} : vector<1x18x18x4xbf16> to vector<1x16x16x4xbf16>
    %9 = vector.extract_strided_slice %0 {offsets = [0, 2, 2, 0], sizes = [1, 16, 16, 4], strides = [1, 1, 1, 1]} : vector<1x18x18x4xbf16> to vector<1x16x16x4xbf16>
    %10 = tpu.concatenate %1, %2, %3, %4, %5, %6, %7, %8, %9 in 3 : vector<1x16x16x4xbf16>, vector<1x16x16x4xbf16>, vector<1x16x16x4xbf16>, vector<1x16x16x4xbf16>, vector<1x16x16x4xbf16>, vector<1x16x16x4xbf16>, vector<1x16x16x4xbf16>, vector<1x16x16x4xbf16>, vector<1x16x16x4xbf16> -> vector<1x16x16x36xbf16>
    %11 = vector.shape_cast %10 : vector<1x16x16x36xbf16> to vector<256x36xbf16>
    %c0_3 = arith.constant 0 : index
    %c0_4 = arith.constant 0 : index
    %12 = vector.load %arg2[%c0_3, %c0_4] : memref<36x32xbf16, #tpu.memory_space<vmem>>, vector<36x32xbf16>
    %cst = arith.constant dense<0.000000e+00> : vector<256x32xf32>
    %13 = tpu.matmul %11, %12, %cst {dimension_numbers = #tpu.dot_dimension_numbers<[1], [0], [0], [1], [0, 0, 1, 1], [], []>} : vector<256x36xbf16>, vector<36x32xbf16>, vector<256x32xf32> -> vector<256x32xf32>
    %c0_5 = arith.constant 0 : index
    %c0_6 = arith.constant 0 : index
    %14 = vector.load %arg3[%c0_5, %c0_6] : memref<1x32xf32, #tpu.memory_space<vmem>>, vector<1x32xf32>
    %15 = vector.broadcast %14 : vector<1x32xf32> to vector<256x32xf32>
    %16 = arith.addf %13, %15 : vector<256x32xf32>
    %cst_7 = arith.constant 0.000000e+00 : f32
    %17 = vector.broadcast %cst_7 : f32 to vector<256x32xf32>
    %18 = arith.maximumf %16, %17 : vector<256x32xf32>
    %19 = vector.shape_cast %18 : vector<256x32xf32> to vector<1x256x32xf32>
    %cst_8 = arith.constant dense<0.000000e+00> : vector<1x32xf32>
    %20 = vector.multi_reduction <add>, %19, %cst_8 [1] : vector<1x256x32xf32> to vector<1x32xf32>
    %cst_9 = arith.constant 3.906250e-03 : f32
    %21 = vector.broadcast %cst_9 : f32 to vector<1x32xf32>
    %22 = arith.mulf %20, %21 : vector<1x32xf32>
    %c0_10 = arith.constant 0 : index
    %c0_11 = arith.constant 0 : index
    %23 = vector.load %arg4[%c0_10, %c0_11] : memref<32x128xf32, #tpu.memory_space<vmem>>, vector<32x128xf32>
    %cst_12 = arith.constant dense<0.000000e+00> : vector<1x128xf32>
    %24 = tpu.matmul %22, %23, %cst_12 {dimension_numbers = #tpu.dot_dimension_numbers<[1], [0], [0], [1], [0, 0, 1, 1], [], []>} : vector<1x32xf32>, vector<32x128xf32>, vector<1x128xf32> -> vector<1x128xf32>
    %c0_13 = arith.constant 0 : index
    %c0_14 = arith.constant 0 : index
    %25 = vector.load %arg5[%c0_13, %c0_14] : memref<1x128xf32, #tpu.memory_space<vmem>>, vector<1x128xf32>
    %26 = arith.addf %24, %25 : vector<1x128xf32>
    %c0_15 = arith.constant 0 : index
    %c0_16 = arith.constant 0 : index
    %c0_17 = arith.constant 0 : index
    %27 = vector.load %arg6[%c0_15, %c0_16, %c0_17] : memref<1x1x128xf32, #tpu.memory_space<vmem>>, vector<1x1x128xf32>
    %28 = vector.shape_cast %27 : vector<1x1x128xf32> to vector<1x128xf32>
    %29 = vector.shape_cast %26 : vector<1x128xf32> to vector<1x1x128xf32>
    tpu.vector_store %arg6[%c0_15, %c0_16, %c0_17], %29 {strides = array<i32>} : memref<1x1x128xf32, #tpu.memory_space<vmem>>, vector<1x1x128xf32>,
    return
  }
  func.func @transform_0(%arg0: i32) -> (i32, i32, i32, i32) {
    %c0_i32 = arith.constant 0 : i32
    %c0_i32_0 = arith.constant 0 : i32
    %c0_i32_1 = arith.constant 0 : i32
    %c0_i32_2 = arith.constant 0 : i32
    return %arg0, %c0_i32, %c0_i32_0, %c0_i32_1 : i32, i32, i32, i32
  }
  func.func @transform_1(%arg0: i32) -> (i32, i32) {
    %c0_i32 = arith.constant 0 : i32
    %c0_i32_0 = arith.constant 0 : i32
    %c0_i32_1 = arith.constant 0 : i32
    return %c0_i32, %c0_i32_0 : i32, i32
  }
  func.func @transform_2(%arg0: i32) -> (i32, i32) {
    %c0_i32 = arith.constant 0 : i32
    %c0_i32_0 = arith.constant 0 : i32
    %c0_i32_1 = arith.constant 0 : i32
    return %c0_i32, %c0_i32_0 : i32, i32
  }
  func.func @transform_3(%arg0: i32) -> (i32, i32) {
    %c0_i32 = arith.constant 0 : i32
    %c0_i32_0 = arith.constant 0 : i32
    %c0_i32_1 = arith.constant 0 : i32
    return %c0_i32, %c0_i32_0 : i32, i32
  }
  func.func @transform_4(%arg0: i32) -> (i32, i32) {
    %c0_i32 = arith.constant 0 : i32
    %c0_i32_0 = arith.constant 0 : i32
    %c0_i32_1 = arith.constant 0 : i32
    return %c0_i32, %c0_i32_0 : i32, i32
  }
  func.func @transform_5(%arg0: i32) -> (i32, i32, i32) {
    %c0_i32 = arith.constant 0 : i32
    %c0_i32_0 = arith.constant 0 : i32
    %c0_i32_1 = arith.constant 0 : i32
    return %arg0, %c0_i32, %c0_i32_0 : i32, i32, i32
  }
}

</mosaic_0001>

<bundles_post_ra>
// kernel: tpu_custom_call.1
= control target key start
LH: loop header
LB: loop body
LE: loop exit
PB: predicated region body
PF: predicated region fallthrough
CT: control target
= control target key end

     0   :  { %10 = vsyncpa [#allocation3], 0  ;;  %s2707_s0 = inlined_call_operand.vmem [shape: bf16[2,18,18,4], index: 0, kind: input, shape index: {}]   ;;  %s2708_s1 = inlined_call_operand.vmem [shape: bf16[36,32], index: 1, kind: input, shape index: {}]   ;;  %s2709_s2 = inlined_call_operand.vmem [shape: f32[1,32], index: 2, kind: input, shape index: {}]   ;;  %s2710_s3 = inlined_call_operand.vmem [shape: f32[32,128], index: 3, kind: input, shape index: {}]   ;;  %s2711_s4 = inlined_call_operand.vmem [shape: f32[1,128], index: 4, kind: input, shape index: {}]   ;;  %s2712_s5 = inlined_call_operand.hbm [shape: f32[2,1,128], index: 5, kind: output, shape index: {}]  }
   0x1   :  { %12 = vsyncpa [#allocation3 + $0x1], 0  ;;  %s2035_s18 = smov 0   ;;  %s2037_s19 = smov 0  }
   0x2   :  { %s2039_s20 = smov 0   ;;  %s2041_s21 = smov 0  }
   0x3 LB: > { %s2056_s22 = sadd.s32 4294967295, %s1991_s21   ;;  %s1687_s23 = sadd.s32 4294967294, %s1991_s21   ;;  %s1991_s21 = sphi %s2041_s21, %s2718_s21   ;;  %s1987_s20 = sphi %s2039_s20, %s2717_s20   ;;  %s1983_s19 = sphi %s2037_s19, %s2716_s19   ;;  %s1979_s18 = sphi %s2035_s18, %s2715_s18  }
   0x4   : > { %s2060_s24 = sadd.s32 1, %s1991_s21   ;;  %s135_s25 = sadd.s32 1, %s1987_s20 }
   0x5   : > { %s132_s26 = ssub.s32 %s1991_s21, %s2060_s24  ;;  %p145_p0 = scmp.ne.s32.totalorder %s1987_s20, %s1983_s19 }
   0x6   : > { %p133_p1 = scmp.eq.s32.totalorder %s132_s26, 0  ;;  %p146_p2 = scmp.eq.s32.totalorder %s2056_s22, 1 }
   0x7   : > { %p151_p3 = scmp.ne.s32.totalorder %s1983_s19, %s1979_s18  ;;  %p152_p4 = scmp.eq.s32.totalorder %s1687_s23, 1 }
   0x8   : > { %s2071_s27 = scalar_select %p133_p1, %s1987_s20, %s135_s25  }
   0x9   : > { %p2073_p5 = por %p146_p2, %p145_p0  ;;  %p2077_p6 = por %p152_p4, %p151_p3 }
   0xa   : > { %p1690_p7 = scmp.ge.s32.totalorder %s1991_s21, 1  ;;  %p190_p8 = scmp.lt.s32.totalorder %s1991_s21, 3 }
   0xc   : > { %p191_p9 = pnand %p1690_p7, %p190_p8 }
   0xd   : > { %p217_p10 = scmp.lt.s32.totalorder (!%p191_p9), %s2056_s22, 1  ;;  %vm630_vm0 = vcmask (!%p191_p9), 1046528   ;;  %s1993_s10 = smov (!%p191_p9), 12   ;;  %vm405_vm1 = vsmask.f32 (!%p191_p9), 7424  ;;  %v1910_v44 = vld [vmem:[%s2708_s1] sm:$0xff] (!%p191_p9)  }
   0xe   : > { %194 = sbr.rel (%p191_p9) target bundleno = 864 (0x360), region = 40  ;;  %s1994_s11 = smov (!%p191_p9), 20   ;;  %1776 = vmatprep.subr.bf16.mxu0 (!%p191_p9), %v1910_v44  ;;  %v1912_v46 = vld [vmem:[%s2708_s1 + $0x8] sm:$0xff] (!%p191_p9)   ;;  %1831 = vmatprep.subr.bf16.mxu1 (!%p191_p9), %v1910_v44  ;;  %v1914_v50 = vld [vmem:[%s2708_s1 + $0x10] ss:$0 sps:$4 sm:$0x33] (!%p191_p9)  }
   0xf   : > { %s1995_s12 = smov (!%p191_p9), 8   ;;  %s1996_s13 = smov (!%p191_p9), 4   ;;  %1777 = vmatpush3.bf16.msra.mxu0 (!%p191_p9), %v1910_v44  ;;  %1834 = vmatpush3.bf16.msra.mxu1 (!%p191_p9), %v1910_v44  ;;  %vm1273_vm2 = vcmask (!%p191_p9), 1041408   ;;  %vm949_vm3 = vcmask (!%p191_p9), 31744   ;;  %vm982_vm4 = vcmask (!%p191_p9), 64512   ;;  %vm1015_vm5 = vcmask (!%p191_p9), 97280  }
  0x10   : > { %s1997_s14 = smov (!%p191_p9), 16   ;;  %s1998_s17 = smov (!%p191_p9), 24   ;;  %1778 = vmatprep.subr.bf16.mxu0 (!%p191_p9), %v1912_v46  ;;  %1832 = vmatprep.subr.bf16.mxu1 (!%p191_p9), %v1912_v46  ;;  %v1275_v54 = vsel (!%p191_p9), %vm1273_vm2, %v1914_v50, 0  ;;  %vm1048_vm6 = vcmask (!%p191_p9), 130048   ;;  %vm1081_vm7 = vcmask (!%p191_p9), 162816   ;;  %vm1114_vm8 = vcmask (!%p191_p9), 195584  }
  0x11   : > { %s1999_s26 = smov (!%p191_p9), 28   ;;  %s2000_s7 = smov (!%p191_p9), 32   ;;  %vm1147_vm9 = vcmask (!%p191_p9), 228352   ;;  %vm1180_vm10 = vcmask (!%p191_p9), 261120   ;;  %vm1240_vm11 = vcmask (!%p191_p9), 293888   ;;  %vm2002_vm12 = vmmov (!%p191_p9), 0  }
  0x12   : > { %s215_s23 = sand.u32 (!%p191_p9), 1, %s1983_s19  }
  0x13   : > { %1779 = vmatpush3.bf16.msra.mxu0 (!%p191_p9), %v1912_v46  ;;  %1835 = vmatpush3.bf16.msra.mxu1 (!%p191_p9), %v1912_v46 }
  0x14   : > { %1837 = vmatprep.subr.msk.bf16.mxu0 (!%p191_p9), %vm1273_vm2, %v1914_v50  ;;  %1838 = vmatprep.subr.msk.bf16.mxu1 (!%p191_p9), %vm1273_vm2, %v1914_v50 }
  0x15   : > { %s218_s30 = scalar_select %p217_p10, %s2056_s22, 1 }
  0x17   : > { %s1839_s6 = smul.u32 216, %s218_s30  ;;  %1781 = vmatpush3.bf16.msra.mxu0 %v1275_v54  ;;  %1836 = vmatpush3.bf16.msra.mxu1 %v1275_v54  ;;  %s1749_s30 = sshll.u32 %s2056_s22, 4 }
  0x18   : > { %s2004_s22 = smov [#allocation2]  }
  0x19   : > { %s2088_s9 = scalar_lea.vmem %s2707_s0, %s1839_s6  ;;  %s216_s6 = scalar_lea.vmem [#allocation2], %s215_s23 }
  0x1a   : > { %v2091_v0 = vld [vmem:[%s2088_s9 + $0x18] sm:$0xff]   ;;  %v2094_v1 = vld [vmem:[%s2088_s9 + $0xc] sm:$0xff]   ;;  %v1892_v2 = vld [vmem:[%s2088_s9 + $0x14] ss:$0 sps:$4 sm:$0x11]  }
  0x1b   : > { %718 = vrot.lane.b32.xlu1 %v2091_v0, %s1993_s10  ;;  %v2100_v3 = vld [vmem:[%s2088_s9] sm:$0xff]   ;;  %716 = vrot.lane.b32.xlu0 %v2094_v1, %s1993_s10  ;;  %v634_v4 = vrot.slane %v2094_v1, 1  ;;  %v635_v5 = vrot.slane %v1892_v2, 1  ;;  %v1894_v6 = vld [vmem:[%s2088_s9 + $0x8] ss:$0 sps:$4 sm:$0x11]  }
  0x1c   : > { %v631_v7 = vrot.slane %v2100_v3, 1  ;;  %v407_v8 = vshrl.u32 %v2100_v3, 16  ;;  %v409_v9 = vshll.u32 %v2100_v3, 16  ;;  %v419_v10 = vshrl.u32 %v2094_v1, 16  ;;  %v2120_v30 = vld [vmem:[%s2088_s9 + $0x24] sm:$0xff]   ;;  %v2150_v49 = vld [vmem:[%s2088_s9 + $0x30] sm:$0xff]  }
  0x1d   : > { %v636_v11 = vsel %vm630_vm0, %v634_v4, %v635_v5  ;;  %v632_v12 = vrot.slane %v1894_v6, 1  ;;  %v414_v13 = vshll.u32 %v1894_v6, 16  ;;  %v1895_v14 = vld [vmem:[%s2088_s9 + $0x20] ss:$0 sps:$4 sm:$0x11]   ;;  %v421_v15 = vshll.u32 %v2094_v1, 16 }
  0x1e   : > { %v411_v16 = vrot.slane %v409_v9, 1  ;;  %v426_v17 = vshll.u32 %v1892_v2, 16  ;;  %v433_v18 = vshll.u32 %v2091_v0, 16  ;;  %v637_v23 = vrot.slane %v2091_v0, 1  ;;  %v2166_v60 = vld [vmem:[%s2088_s9 + $0x3c] sm:$0xff]  }
  0x1f   : > { %798 = vrot.lane.b32.xlu0 %v636_v11, %s1994_s11  ;;  %v633_v19 = vsel %vm630_vm0, %v631_v7, %v632_v12  ;;  %v416_v20 = vrot.slane %v414_v13, 1  ;;  %v423_v21 = vrot.slane %v421_v15, 1  ;;  %v431_v25 = vshrl.u32 %v2091_v0, 16  ;;  %v1897_v33 = vld [vmem:[%s2088_s9 + $0x2c] ss:$0 sps:$4 sm:$0x11]  }
  0x20   : > { %679 = vrot.lane.b32.xlu1 %v633_v19, %s1995_s12  ;;  %v412_v22 = vor.u32 %v411_v16, %v407_v8  ;;  %v428_v24 = vrot.slane %v426_v17, 1  ;;  %v638_v26 = vrot.slane %v1895_v14, 1  ;;  %v435_v28 = vrot.slane %v433_v18, 1  ;;  %v1899_v51 = vld [vmem:[%s2088_s9 + $0x38] ss:$0 sps:$4 sm:$0x11]  }
  0x21   : > { %v424_v27 = vor.u32 %v423_v21, %v419_v10  ;;  %v438_v29 = vshll.u32 %v1895_v14, 16  ;;  %v445_v37 = vshll.u32 %v2120_v30, 16  ;;  %v443_v39 = vshrl.u32 %v2120_v30, 16  ;;  %v1901_v2 = vld [vmem:[%s2088_s9 + $0x44] ss:$0 sps:$4 sm:$0x11]  }
  0x22   : > { %v417_v31 = vsel %vm405_vm1, %v412_v22, %v416_v20  ;;  %v639_v34 = vsel %vm630_vm0, %v637_v23, %v638_v26  ;;  %v436_v35 = vor.u32 %v435_v28, %v431_v25  ;;  %v450_v41 = vshll.u32 %v1897_v33, 16  ;;  %v2191_v14 = vld [vmem:[%s2088_s9 + $0x48] sm:$0xff]   ;;  %v1903_v16 = vld [vmem:[%s2088_s9 + $0x50] ss:$0 sps:$4 sm:$0x11]   ;;  %v2204_v23 = vld [vmem:[%s2088_s9 + $0x54] sm:$0xff]  }
  0x23   : > { %598 = vrot.lane.b32.xlu0 %v417_v31, %s1996_s13  ;;  %v429_v32 = vsel %vm405_vm1, %v424_v27, %v428_v24  ;;  %v440_v36 = vrot.slane %v438_v29, 1  ;;  %v447_v40 = vrot.slane %v445_v37, 1  ;;  %v640_v47 = vrot.slane %v2120_v30, 1  ;;  %v1905_v27 = vld [vmem:[%s2088_s9 + $0x5c] ss:$0 sps:$4 sm:$0x11]  }
  0x24   : > { %681 = vrot.lane.b32.xlu1 %v636_v11, %s1995_s12  ;;  %v452_v43 = vrot.slane %v450_v41, 1  ;;  %v641_v48 = vrot.slane %v1897_v33, 1  ;;  %v457_v53 = vshll.u32 %v2150_v49, 16  ;;  %v455_v55 = vshrl.u32 %v2150_v49, 16 }
  0x25   : > { %v441_v38 = vsel %vm405_vm1, %v436_v35, %v440_v36  ;;  %v448_v42 = vor.u32 %v447_v40, %v443_v39  ;;  %v462_v57 = vshll.u32 %v1899_v51, 16  ;;  %v643_v62 = vrot.slane %v2150_v49, 1  ;;  %v2229_v39 = vld [vmem:[%s2088_s9 + $0x60] sm:$0xff]   ;;  %v1907_v41 = vld [vmem:[%s2088_s9 + $0x68] ss:$0 sps:$4 sm:$0x11]  }
  0x26   : > { %v642_v52 = vsel %vm630_vm0, %v640_v47, %v641_v48  ;;  %v459_v56 = vrot.slane %v457_v53, 1  ;;  %v644_v63 = vrot.slane %v1899_v51, 1  ;;  %v469_v4 = vshll.u32 %v2166_v60, 16  ;;  %v2242_v48 = vld [vmem:[%s2088_s9 + $0x6c] sm:$0xff]  }
  0x27   : > { %600 = vrot.lane.b32.xlu0 %v429_v32, %s1996_s13  ;;  %v453_v45 = vsel %vm405_vm1, %v448_v42, %v452_v43  ;;  %v464_v59 = vrot.slane %v462_v57, 1  ;;  %v467_v6 = vshrl.u32 %v2166_v60, 16  ;;  %v474_v8 = vshll.u32 %v1901_v2, 16  ;;  %v1909_v53 = vld [vmem:[%s2088_s9 + $0x74] ss:$0 sps:$4 sm:$0x11]  }
  0x28   : > { %800 = vrot.lane.b32.xlu1 %v639_v34, %s1994_s11  ;;  %v460_v58 = vor.u32 %v459_v56, %v455_v55  ;;  %v645_v5 = vsel %vm630_vm0, %v643_v62, %v644_v63  ;;  %v471_v7 = vrot.slane %v469_v4, 1  ;;  %v646_v12 = vrot.slane %v2166_v60, 1 }
  0x29   : > { %v476_v10 = vrot.slane %v474_v8, 1  ;;  %v647_v13 = vrot.slane %v1901_v2, 1  ;;  %v481_v17 = vshll.u32 %v2191_v14, 16  ;;  %v479_v18 = vshrl.u32 %v2191_v14, 16 }
  0x2a   : > { %v465_v61 = vsel %vm405_vm1, %v460_v58, %v464_v59  ;;  %v472_v9 = vor.u32 %v471_v7, %v467_v6  ;;  %v486_v20 = vshll.u32 %v1903_v16, 16  ;;  %v649_v25 = vrot.slane %v2191_v14, 1 }
  0x2b   : > { %763 = vrot.lane.b32.xlu0 %v429_v32, %s1997_s14  ;;  %v648_v15 = vsel %vm630_vm0, %v646_v12, %v647_v13  ;;  %v483_v19 = vrot.slane %v481_v17, 1  ;;  %v650_v26 = vrot.slane %v1903_v16, 1  ;;  %v493_v28 = vshll.u32 %v2204_v23, 16  ;;  %v1913_v13 = vld [vmem:[%s2088_s9 + $0x80] ss:$0 sps:$4 sm:$0x11]  }
  0x2c   : > { %765 = vrot.lane.b32.xlu1 %v441_v38, %s1997_s14  ;;  %v477_v11 = vsel %vm405_vm1, %v472_v9, %v476_v10  ;;  %v488_v22 = vrot.slane %v486_v20, 1  ;;  %v491_v31 = vshrl.u32 %v2204_v23, 16  ;;  %v498_v33 = vshll.u32 %v1905_v27, 16  ;;  %v2267_v9 = vld [vmem:[%s2088_s9 + $0x78] sm:$0xff]  }
  0x2d   : > { %v484_v21 = vor.u32 %v483_v19, %v479_v18  ;;  %v651_v29 = vsel %vm630_vm0, %v649_v25, %v650_v26  ;;  %v495_v32 = vrot.slane %v493_v28, 1  ;;  %v652_v37 = vrot.slane %v2204_v23, 1  ;;  %v2285_v28 = vld [vmem:[%s2088_s9 + $0x84] sm:$0xff]  }
  0x2e   : > { %v500_v35 = vrot.slane %v498_v33, 1  ;;  %v505_v42 = vshll.u32 %v2229_v39, 16  ;;  %v503_v43 = vshrl.u32 %v2229_v39, 16  ;;  %v655_v51 = vrot.slane %v2229_v39, 1 }
  0x2f   : > { %835 = vrot.lane.b32.xlu0 %v2091_v0, %s1998_s17  ;;  %v489_v24 = vsel %vm405_vm1, %v484_v21, %v488_v22  ;;  %v517_v54 = vshll.u32 %v2242_v48, 16  ;;  %v515_v56 = vshrl.u32 %v2242_v48, 16  ;;  %v522_v58 = vshll.u32 %v1909_v53, 16 }
  0x30   : > { %837 = vrot.lane.b32.xlu1 %v2120_v30, %s1998_s17  ;;  %v507_v44 = vrot.slane %v505_v42, 1  ;;  %v658_v6 = vrot.slane %v2242_v48, 1  ;;  %v659_v7 = vrot.slane %v1909_v53, 1  ;;  %v527_v19 = vshrl.u32 %v2267_v9, 16 }
  0x31   : > { %v519_v57 = vrot.slane %v517_v54, 1  ;;  %v524_v63 = vrot.slane %v522_v58, 1  ;;  %v534_v21 = vshll.u32 %v1913_v13, 16  ;;  %v661_v33 = vrot.slane %v2267_v9, 1 }
  0x32   : > { %v508_v46 = vor.u32 %v507_v44, %v503_v43 }
  0x33   : > { %882 = vrot.lane.b32.xlu0 %v441_v38, %s1999_s26  ;;  %v520_v62 = vor.u32 %v519_v57, %v515_v56 }
  0x34   : > { %884 = vrot.lane.b32.xlu1 %v453_v45, %s1999_s26 }
  0x35   : > { %v525_v4 = vsel %vm405_vm1, %v520_v62, %v524_v63 }
  0x37   : > { %917 = vrot.lane.b32.xlu0 %v639_v34, %s2000_s7 }
  0x38   : > { %602 = vrot.lane.b32.xlu1 %v441_v38, %s1996_s13  ;;  %v653_v38 = vrot.slane %v1905_v27, 1 }
  0x3a   : > { %v654_v40 = vsel %vm630_vm0, %v652_v37, %v653_v38  ;;  %v1916_v38 = vld [vmem:[%s2088_s9 + $0x8c] ss:$0 sps:$4 sm:$0x11]  }
  0x3b   : > { %919 = vrot.lane.b32.xlu0 %v642_v52, %s2000_s7 }
  0x3c   : > { %604 = vrot.lane.b32.xlu1 %v453_v45, %s1996_s13 }
  0x3f   : > { %683 = vrot.lane.b32.xlu0 %v639_v34, %s1995_s12  ;;  %v496_v34 = vor.u32 %v495_v32, %v491_v31 }
  0x40   : > { %685 = vrot.lane.b32.xlu1 %v642_v52, %s1995_s12 }
  0x41   : > { %v501_v36 = vsel %vm405_vm1, %v496_v34, %v500_v35  ;;  %v662_v34 = vrot.slane %v1913_v13, 1 }
  0x43   : > { %720 = vrot.lane.b32.xlu0 %v2120_v30, %s1993_s10 }
  0x44   : > { %722 = vrot.lane.b32.xlu1 %v2150_v49, %s1993_s10 }
  0x47   : > { %767 = vrot.lane.b32.xlu0 %v453_v45, %s1997_s14  ;;  %v510_v45 = vshll.u32 %v1907_v41, 16 }
  0x48   : > { %769 = vrot.lane.b32.xlu1 %v465_v61, %s1997_s14 }
  0x49   : > { %v512_v47 = vrot.slane %v510_v45, 1  ;;  %v663_v45 = vsel %vm630_vm0, %v661_v33, %v662_v34 }
  0x4b   : > { %802 = vrot.lane.b32.xlu0 %v642_v52, %s1994_s11  ;;  %v513_v50 = vsel %vm405_vm1, %v508_v46, %v512_v47  ;;  %v656_v52 = vrot.slane %v1907_v41, 1 }
  0x4c   : > { %804 = vrot.lane.b32.xlu1 %v645_v5, %s1994_s11 }
  0x4d   : > { %v657_v55 = vsel %vm630_vm0, %v655_v51, %v656_v52  ;;  %v546_v52 = vshll.u32 %v1916_v38, 16 }
  0x4f   : > { %839 = vrot.lane.b32.xlu0 %v2150_v49, %s1998_s17 }
  0x50   : > { %841 = vrot.lane.b32.xlu1 %v2166_v60, %s1998_s17 }
  0x53   : > { %886 = vrot.lane.b32.xlu0 %v465_v61, %s1999_s26 }
  0x54   : > { %888 = vrot.lane.b32.xlu1 %v477_v11, %s1999_s26 }
  0x57   : > { %921 = vrot.lane.b32.xlu0 %v645_v5, %s2000_s7 }
  0x58   : > { %606 = vrot.lane.b32.xlu1 %v465_v61, %s1996_s13 }
  0x5b   : > { %923 = vrot.lane.b32.xlu0 %v648_v15, %s2000_s7 }
  0x5c   : > { %608 = vrot.lane.b32.xlu1 %v477_v11, %s1996_s13 }
  0x5f   : > { %687 = vrot.lane.b32.xlu0 %v645_v5, %s1995_s12 }
  0x60   : > { %689 = vrot.lane.b32.xlu1 %v648_v15, %s1995_s12 }
  0x63   : > { %724 = vrot.lane.b32.xlu0 %v2166_v60, %s1993_s10 }
  0x64   : > { %726 = vrot.lane.b32.xlu1 %v2191_v14, %s1993_s10 }
  0x67   : > { %771 = vrot.lane.b32.xlu0 %v477_v11, %s1997_s14  ;;  %v660_v11 = vsel %vm630_vm0, %v658_v6, %v659_v7  ;;  %v664_v6 = vrot.slane %v2285_v28, 1  ;;  %v665_v7 = vrot.slane %v1916_v38, 1 }
  0x68   : > { %773 = vrot.lane.b32.xlu1 %v489_v24, %s1997_s14 }
  0x6b   : > { %806 = vrot.lane.b32.xlu0 %v648_v15, %s1994_s11  ;;  %v529_v15 = vshll.u32 %v2267_v9, 16 }
  0x6c   : > { %808 = vrot.lane.b32.xlu1 %v651_v29, %s1994_s11 }
  0x6d   : > { %v531_v20 = vrot.slane %v529_v15, 1  ;;  %v1918_v15 = vld [vmem:[%s2088_s9 + $0x98] ss:$0 sps:$4 sm:$0x11]  }
  0x6f   : > { %843 = vrot.lane.b32.xlu0 %v2191_v14, %s1998_s17  ;;  %v532_v27 = vor.u32 %v531_v20, %v527_v19 }
  0x70   : > { %845 = vrot.lane.b32.xlu1 %v2204_v23, %s1998_s17 }
  0x73   : > { %890 = vrot.lane.b32.xlu0 %v489_v24, %s1999_s26 }
  0x74   : > { %892 = vrot.lane.b32.xlu1 %v501_v36, %s1999_s26 }
  0x77   : > { %925 = vrot.lane.b32.xlu0 %v651_v29, %s2000_s7 }
  0x78   : > { %610 = vrot.lane.b32.xlu1 %v489_v24, %s1996_s13 }
  0x7b   : > { %927 = vrot.lane.b32.xlu0 %v654_v40, %s2000_s7 }
  0x7c   : > { %612 = vrot.lane.b32.xlu1 %v501_v36, %s1996_s13 }
  0x7f   : > { %691 = vrot.lane.b32.xlu0 %v651_v29, %s1995_s12 }
  0x80   : > { %693 = vrot.lane.b32.xlu1 %v654_v40, %s1995_s12 }
  0x83   : > { %728 = vrot.lane.b32.xlu0 %v2204_v23, %s1993_s10 }
  0x84   : > { %730 = vrot.lane.b32.xlu1 %v2229_v39, %s1993_s10 }
  0x87   : > { %775 = vrot.lane.b32.xlu0 %v501_v36, %s1997_s14 }
  0x88   : > { %777 = vrot.lane.b32.xlu1 %v513_v50, %s1997_s14 }
  0x8b   : > { %810 = vrot.lane.b32.xlu0 %v654_v40, %s1994_s11  ;;  %v541_v40 = vshll.u32 %v2285_v28, 16 }
  0x8c   : > { %812 = vrot.lane.b32.xlu1 %v657_v55, %s1994_s11 }
  0x8d   : > { %v719_v59 = vpop.permute.xlu1 %718  ;;  %v717_v61 = vpop.permute.xlu0 %716  ;;  %v543_v51 = vrot.slane %v541_v40, 1 }
  0x8f   : > { %847 = vrot.lane.b32.xlu0 %v2229_v39, %s1998_s17 }
  0x90   : > { %849 = vrot.lane.b32.xlu1 %v2242_v48, %s1998_s17 }
  0x91   : > { %v799_v2 = vpop.permute.xlu0 %798 }
  0x92   : > { %v680_v5 = vpop.permute.xlu1 %679 }
  0x93   : > { %894 = vrot.lane.b32.xlu0 %v513_v50, %s1999_s26 }
  0x94   : > { %896 = vrot.lane.b32.xlu1 %v525_v4, %s1999_s26 }
  0x95   : > { %v599_v8 = vpop.permute.xlu0 %598 }
  0x96   : > { %v682_v10 = vpop.permute.xlu1 %681  ;;  %v951_v17 = vsel %vm949_vm3, %v2100_v3, %v599_v8  ;;  %v536_v3 = vrot.slane %v534_v21, 1  ;;  %v558_v21 = vshll.u32 %v1918_v15, 16 }
  0x97   : > { %929 = vrot.lane.b32.xlu0 %v657_v55, %s2000_s7  ;;  %v984_v25 = vsel %vm982_vm4, %v951_v17, %v680_v5 }
  0x98   : > { %614 = vrot.lane.b32.xlu1 %v513_v50, %s1996_s13  ;;  %v1017_v32 = vsel %vm1015_vm5, %v984_v25, %v717_v61  ;;  %v537_v37 = vsel %vm405_vm1, %v532_v27, %v536_v3  ;;  %v539_v50 = vshrl.u32 %v2285_v28, 16  ;;  %v548_v61 = vrot.slane %v546_v52, 1  ;;  %v2338_v27 = vld [vmem:[%s2088_s9 + $0x9c] sm:$0xff]  }
  0x99   : > { %v601_v12 = vpop.permute.xlu0 %600 }
  0x9a   : > { %v801_v16 = vpop.permute.xlu1 %800  ;;  %v953_v24 = vsel %vm949_vm3, %v2094_v1, %v601_v12  ;;  %v666_v12 = vsel %vm630_vm0, %v664_v6, %v665_v7  ;;  %v670_v6 = vrot.slane %v2338_v27, 1 }
  0x9b   : > { %931 = vrot.lane.b32.xlu0 %v660_v11, %s2000_s7  ;;  %v986_v29 = vsel %vm982_vm4, %v953_v24, %v682_v10  ;;  %v2325_v10 = vld [vmem:[%s2088_s9 + $0x90] sm:$0xff]  }
  0x9c   : > { %616 = vrot.lane.b32.xlu1 %v525_v4, %s1996_s13  ;;  %v1019_v35 = vsel %vm1015_vm5, %v986_v29, %v719_v59  ;;  %v544_v59 = vor.u32 %v543_v51, %v539_v50  ;;  %v551_v19 = vshrl.u32 %v2325_v10, 16 }
  0x9d   : > { %v764_v18 = vpop.permute.xlu0 %763 }
  0x9e   : > { %v766_v22 = vpop.permute.xlu1 %765  ;;  %v1050_v1 = vsel %vm1048_vm6, %v1017_v32, %v764_v18  ;;  %v667_v32 = vrot.slane %v2325_v10, 1 }
  0x9f   : > { %695 = vrot.lane.b32.xlu0 %v657_v55, %s1995_s12  ;;  %v1083_v42 = vsel %vm1081_vm7, %v1050_v1, %v799_v2  ;;  %v1052_v43 = vsel %vm1048_vm6, %v1019_v35, %v766_v22  ;;  %v668_v1 = vrot.slane %v1918_v15, 1 }
  0xa0   : > { %697 = vrot.lane.b32.xlu1 %v660_v11, %s1995_s12  ;;  %v1085_v55 = vsel %vm1081_vm7, %v1052_v43, %v801_v16  ;;  %v553_v16 = vshll.u32 %v2325_v10, 16 }
  0xa1   : > { %v836_v26 = vpop.permute.xlu0 %835 }
  0xa2   : > { %v838_v31 = vpop.permute.xlu1 %837  ;;  %v1116_v44 = vsel %vm1114_vm8, %v1083_v42, %v836_v26  ;;  %v555_v20 = vrot.slane %v553_v16, 1  ;;  %v560_v26 = vrot.slane %v558_v21, 1  ;;  %v1922_v16 = vld [vmem:[%s2088_s9 + $0xb0] ss:$0 sps:$4 sm:$0x11]  }
  0xa3   : > { %732 = vrot.lane.b32.xlu0 %v2242_v48, %s1993_s10  ;;  %v1118_v56 = vsel %vm1114_vm8, %v1085_v55, %v838_v31 }
  0xa4   : > { %734 = vrot.lane.b32.xlu1 %v2267_v9, %s1993_s10  ;;  %v556_v25 = vor.u32 %v555_v20, %v551_v19 }
  0xa5   : > { %v883_v36 = vpop.permute.xlu0 %882 }
  0xa6   : > { %v885_v41 = vpop.permute.xlu1 %884  ;;  %v1149_v46 = vsel %vm1147_vm9, %v1116_v44, %v883_v36  ;;  %v561_v35 = vsel %vm405_vm1, %v556_v25, %v560_v26  ;;  %v1920_v36 = vld [vmem:[%s2088_s9 + $0xa4] ss:$0 sps:$4 sm:$0x11]   ;;  %v669_v44 = vsel %vm630_vm0, %v667_v32, %v668_v1 }
  0xa7   : > { %779 = vrot.lane.b32.xlu0 %v525_v4, %s1997_s14  ;;  %v1151_v57 = vsel %vm1147_vm9, %v1118_v56, %v885_v41  ;;  %v549_v4 = vsel %vm405_vm1, %v544_v59, %v548_v61  ;;  %v570_v51 = vshll.u32 %v1920_v36, 16  ;;  %v671_v7 = vrot.slane %v1920_v36, 1 }
  0xa8   : > { %781 = vrot.lane.b32.xlu1 %v537_v37, %s1997_s14 }
  0xa9   : > { %v918_v47 = vpop.permute.xlu0 %917  ;;  %v572_v61 = vrot.slane %v570_v51, 1 }
  0xaa   : > { %v603_v53 = vpop.permute.xlu1 %602  ;;  %v1182_v54 = vsel %vm1180_vm10, %v1149_v46, %v918_v47 }
  0xab   : > { %814 = vrot.lane.b32.xlu0 %v660_v11, %s1994_s11  ;;  %1782 = vmatprep.mubr.msk.bf16.mxu0 %vm1240_vm11, %v1182_v54  ;;  %v955_v29 = vsel %vm949_vm3, %v2091_v0, %v603_v53 }
  0xac   : > { %816 = vrot.lane.b32.xlu1 %v663_v45, %s1994_s11 }
  0xad   : > { %v920_v58 = vpop.permute.xlu0 %919 }
  0xae   : > { %v605_v62 = vpop.permute.xlu1 %604  ;;  %v1184_v63 = vsel %vm1180_vm10, %v1151_v57, %v920_v58 }
  0xaf   : > { %851 = vrot.lane.b32.xlu0 %v2267_v9, %s1998_s17  ;;  %1783 = vmatmul.mubr.msk.bf16.vlgmr.msra.gmra.mrb[0].mxu0 %vm1240_vm11, %v1184_v63  ;;  %v957_v40 = vsel %vm949_vm3, %v2120_v30, %v605_v62 }
  0xb0   : > { %853 = vrot.lane.b32.xlu1 %v2285_v28, %s1998_s17 }
  0xb1   : > { %v684_v2 = vpop.permute.xlu0 %683 }
  0xb2   : > { %v686_v5 = vpop.permute.xlu1 %685  ;;  %v988_v31 = vsel %vm982_vm4, %v955_v29, %v684_v2  ;;  %v2396_v29 = vld [vmem:[%s2088_s9 + $0xb4] sm:$0xff]  }
  0xb3   : > { %898 = vrot.lane.b32.xlu0 %v537_v37, %s1999_s26  ;;  %v990_v42 = vsel %vm982_vm4, %v957_v40, %v686_v5 }
  0xb4   : > { %900 = vrot.lane.b32.xlu1 %v549_v4, %s1999_s26 }
  0xb5   : > { %v721_v8 = vpop.permute.xlu0 %720 }
  0xb6   : > { %v723_v11 = vpop.permute.xlu1 %722  ;;  %v1021_v33 = vsel %vm1015_vm5, %v988_v31, %v721_v8 }
  0xb7   : > { %933 = vrot.lane.b32.xlu0 %v663_v45, %s2000_s7  ;;  %v1023_v46 = vsel %vm1015_vm5, %v990_v42, %v723_v11  ;;  %v2383_v11 = vld [vmem:[%s2088_s9 + $0xa8] sm:$0xff]  }
  0xb8   : > { %618 = vrot.lane.b32.xlu1 %v537_v37, %s1996_s13  ;;  %v565_v37 = vshll.u32 %v2338_v27, 16  ;;  %v575_v20 = vshrl.u32 %v2383_v11, 16 }
  0xb9   : > { %v768_v13 = vpop.permute.xlu0 %767 }
  0xba   : > { %v770_v17 = vpop.permute.xlu1 %769  ;;  %v1054_v0 = vsel %vm1048_vm6, %v1021_v33, %v768_v13  ;;  %v567_v30 = vrot.slane %v565_v37, 1  ;;  %v672_v13 = vsel %vm630_vm0, %v670_v6, %v671_v7  ;;  %v673_v33 = vrot.slane %v2383_v11, 1 }
  0xbb   : > { %935 = vrot.lane.b32.xlu0 %v666_v12, %s2000_s7  ;;  %v1056_v52 = vsel %vm1048_vm6, %v1023_v46, %v770_v17  ;;  %v577_v17 = vshll.u32 %v2383_v11, 16  ;;  %v587_v46 = vshrl.u32 %v2396_v29, 16  ;;  %v676_v6 = vrot.slane %v2396_v29, 1 }
  0xbc   : > { %620 = vrot.lane.b32.xlu1 %v549_v4, %s1996_s13 }
  0xbd   : > { %v803_v18 = vpop.permute.xlu0 %802  ;;  %v579_v21 = vrot.slane %v577_v17, 1  ;;  %v1926_v17 = vld [vmem:[%s2088_s9 + $0xc8] ss:$0 sps:$4 sm:$0x11]  }
  0xbe   : > { %v805_v22 = vpop.permute.xlu1 %804  ;;  %v1087_v41 = vsel %vm1081_vm7, %v1054_v0, %v803_v18  ;;  %v1924_v0 = vld [vmem:[%s2088_s9 + $0xbc] ss:$0 sps:$4 sm:$0x11]  }
  0xbf   : > { %699 = vrot.lane.b32.xlu0 %v663_v45, %s1995_s12  ;;  %v563_v45 = vshrl.u32 %v2338_v27, 16  ;;  %v1089_v55 = vsel %vm1081_vm7, %v1056_v52, %v805_v22  ;;  %v582_v22 = vshll.u32 %v1922_v16, 16  ;;  %v580_v26 = vor.u32 %v579_v21, %v575_v20 }
  0xc0   : > { %701 = vrot.lane.b32.xlu1 %v666_v12, %s1995_s12  ;;  %v594_v51 = vshll.u32 %v1924_v0, 16  ;;  %v677_v7 = vrot.slane %v1924_v0, 1 }
  0xc1   : > { %v840_v24 = vpop.permute.xlu0 %839  ;;  %v568_v59 = vor.u32 %v567_v30, %v563_v45 }
  0xc2   : > { %v842_v3 = vpop.permute.xlu1 %841  ;;  %v1120_v43 = vsel %vm1114_vm8, %v1087_v41, %v840_v24 }
  0xc3   : > { %736 = vrot.lane.b32.xlu0 %v2285_v28, %s1993_s10  ;;  %v1122_v56 = vsel %vm1114_vm8, %v1089_v55, %v842_v3  ;;  %v584_v3 = vrot.slane %v582_v22, 1 }
  0xc4   : > { %738 = vrot.lane.b32.xlu1 %v2325_v10, %s1993_s10 }
  0xc5   : > { %v887_v34 = vpop.permute.xlu0 %886  ;;  %v585_v37 = vsel %vm405_vm1, %v580_v26, %v584_v3 }
  0xc6   : > { %v889_v38 = vpop.permute.xlu1 %888  ;;  %v1153_v47 = vsel %vm1147_vm9, %v1120_v43, %v887_v34  ;;  %v674_v34 = vrot.slane %v1922_v16, 1 }
  0xc7   : > { %783 = vrot.lane.b32.xlu0 %v549_v4, %s1997_s14  ;;  %v1155_v57 = vsel %vm1147_vm9, %v1122_v56, %v889_v38  ;;  %v573_v4 = vsel %vm405_vm1, %v568_v59, %v572_v61  ;;  %v589_v38 = vshll.u32 %v2396_v29, 16  ;;  %v596_v61 = vrot.slane %v594_v51, 1 }
  0xc8   : > { %785 = vrot.lane.b32.xlu1 %v561_v35, %s1997_s14  ;;  %v675_v45 = vsel %vm630_vm0, %v673_v33, %v674_v34 }
  0xc9   : > { %v922_v50 = vpop.permute.xlu0 %921 }
  0xca   : > { %v607_v53 = vpop.permute.xlu1 %606  ;;  %v1186_v54 = vsel %vm1180_vm10, %v1153_v47, %v922_v50 }
  0xcb   : > { %818 = vrot.lane.b32.xlu0 %v666_v12, %s1994_s11  ;;  %1786 = vmatprep.mubr.msk.bf16.mxu0 %vm1240_vm11, %v1186_v54  ;;  %v959_v32 = vsel %vm949_vm3, %v2150_v49, %v607_v53 }
  0xcc   : > { %820 = vrot.lane.b32.xlu1 %v669_v44, %s1994_s11 }
  0xcd   : > { %v924_v58 = vpop.permute.xlu0 %923 }
  0xce   : > { %v609_v62 = vpop.permute.xlu1 %608  ;;  %v1188_v63 = vsel %vm1180_vm10, %v1155_v57, %v924_v58 }
  0xcf   : > { %855 = vrot.lane.b32.xlu0 %v2325_v10, %s1998_s17  ;;  %1787 = vmatmul.mubr.msk.bf16.gmra.mrb[4].mxu0 %vm1240_vm11, %v1188_v63  ;;  %v961_v41 = vsel %vm949_vm3, %v2166_v60, %v609_v62  ;;  %v591_v60 = vrot.slane %v589_v38, 1 }
  0xd0   : > { %857 = vrot.lane.b32.xlu1 %v2338_v27, %s1998_s17 }
  0xd1   : > { %v688_v2 = vpop.permute.xlu0 %687  ;;  %v592_v59 = vor.u32 %v591_v60, %v587_v46 }
  0xd2   : > { %v690_v5 = vpop.permute.xlu1 %689  ;;  %v992_v1 = vsel %vm982_vm4, %v959_v32, %v688_v2  ;;  %v1927_v32 = vld [vmem:[%s2088_s9 + $0xcc] sm:$0xff]  }
  0xd3   : > { %902 = vrot.lane.b32.xlu0 %v561_v35, %s1999_s26  ;;  %v994_v43 = vsel %vm982_vm4, %v961_v41, %v690_v5 }
  0xd4   : > { %904 = vrot.lane.b32.xlu1 %v573_v4, %s1999_s26 }
  0xd5   : > { %v725_v8 = vpop.permute.xlu0 %724 }
  0xd6   : > { %v727_v12 = vpop.permute.xlu1 %726 }
  0xd7   : > { %937 = vrot.lane.b32.xlu0 %v669_v44, %s2000_s7  ;;  %v1027_v47 = vsel %vm1015_vm5, %v994_v43, %v727_v12  ;;  %v2441_v12 = vld [vmem:[%s2088_s9 + $0xc0] sm:$0xff]  }
  0xd8   : > { %622 = vrot.lane.b32.xlu1 %v561_v35, %s1996_s13  ;;  %v1025_v35 = vsel %vm1015_vm5, %v992_v1, %v725_v8  ;;  %v752_v21 = vshrl.u32 %v2441_v12, 16 }
  0xd9   : > { %v772_v15 = vpop.permute.xlu0 %771 }
  0xda   : > { %v774_v18 = vpop.permute.xlu1 %773  ;;  %v1058_v49 = vsel %vm1048_vm6, %v1025_v35, %v772_v15  ;;  %v678_v15 = vsel %vm630_vm0, %v676_v6, %v677_v7  ;;  %v795_v35 = vrot.slane %v2441_v12, 1 }
  0xdb   : > { %939 = vrot.lane.b32.xlu0 %v672_v13, %s2000_s7  ;;  %v1060_v52 = vsel %vm1048_vm6, %v1027_v47, %v774_v18  ;;  %v754_v18 = vshll.u32 %v2441_v12, 16  ;;  %v871_v47 = vshrl.u32 %v1927_v32, 16 }
  0xdc   : > { %624 = vrot.lane.b32.xlu1 %v573_v4, %s1996_s13 }
  0xdd   : > { %v807_v19 = vpop.permute.xlu0 %806  ;;  %v756_v22 = vrot.slane %v754_v18, 1 }
  0xde   : > { %v809_v24 = vpop.permute.xlu1 %808  ;;  %v1091_v42 = vsel %vm1081_vm7, %v1058_v49, %v807_v19  ;;  %v1928_v49 = vld [vmem:[%s2088_s9 + $0xd4] ss:$0 sps:$4 sm:$0x11]  }
  0xdf   : > { %703 = vrot.lane.b32.xlu0 %v669_v44, %s1995_s12  ;;  %v1093_v55 = vsel %vm1081_vm7, %v1060_v52, %v809_v24  ;;  %v759_v24 = vshll.u32 %v1926_v17, 16  ;;  %v757_v3 = vor.u32 %v756_v22, %v752_v21  ;;  %v915_v6 = vrot.slane %v1928_v49, 1 }
  0xe0   : > { %705 = vrot.lane.b32.xlu1 %v672_v13, %s1995_s12 }
  0xe1   : > { %v844_v25 = vpop.permute.xlu0 %843 }
  0xe2   : > { %v846_v31 = vpop.permute.xlu1 %845  ;;  %v1124_v44 = vsel %vm1114_vm8, %v1091_v42, %v844_v25 }
  0xe3   : > { %740 = vrot.lane.b32.xlu0 %v2338_v27, %s1993_s10  ;;  %v1126_v56 = vsel %vm1114_vm8, %v1093_v55, %v846_v31  ;;  %v761_v31 = vrot.slane %v759_v24, 1 }
  0xe4   : > { %742 = vrot.lane.b32.xlu1 %v2383_v11, %s1993_s10 }
  0xe5   : > { %v891_v36 = vpop.permute.xlu0 %890  ;;  %v762_v38 = vsel %vm405_vm1, %v757_v3, %v761_v31 }
  0xe6   : > { %v893_v40 = vpop.permute.xlu1 %892  ;;  %v1157_v50 = vsel %vm1147_vm9, %v1124_v44, %v891_v36  ;;  %v796_v36 = vrot.slane %v1926_v17, 1 }
  0xe7   : > { %787 = vrot.lane.b32.xlu0 %v573_v4, %s1997_s14  ;;  %v1159_v57 = vsel %vm1147_vm9, %v1126_v56, %v893_v40  ;;  %v597_v4 = vsel %vm405_vm1, %v592_v59, %v596_v61  ;;  %v873_v40 = vshll.u32 %v1927_v32, 16 }
  0xe8   : > { %789 = vrot.lane.b32.xlu1 %v585_v37, %s1997_s14  ;;  %v797_v46 = vsel %vm630_vm0, %v795_v35, %v796_v36 }
  0xe9   : > { %v926_v30 = vpop.permute.xlu0 %925  ;;  %v875_v51 = vrot.slane %v873_v40, 1 }
  0xea   : > { %v611_v53 = vpop.permute.xlu1 %610  ;;  %v1190_v54 = vsel %vm1180_vm10, %v1157_v50, %v926_v30 }
  0xeb   : > { %822 = vrot.lane.b32.xlu0 %v672_v13, %s1994_s11  ;;  %1790 = vmatprep.mubr.msk.bf16.mxu0 %vm1240_vm11, %v1190_v54  ;;  %v963_v33 = vsel %vm949_vm3, %v2191_v14, %v611_v53  ;;  %v876_v59 = vor.u32 %v875_v51, %v871_v47 }
  0xec   : > { %824 = vrot.lane.b32.xlu1 %v675_v45, %s1994_s11 }
  0xed   : > { %v928_v58 = vpop.permute.xlu0 %927 }
  0xee   : > { %v613_v62 = vpop.permute.xlu1 %612  ;;  %v1192_v63 = vsel %vm1180_vm10, %v1159_v57, %v928_v58 }
  0xef   : > { %859 = vrot.lane.b32.xlu0 %v2383_v11, %s1998_s17  ;;  %1791 = vmatmul.mubr.msk.bf16.gmra.mrb[8].mxu0 %vm1240_vm11, %v1192_v63  ;;  %v965_v42 = vsel %vm949_vm3, %v2204_v23, %v613_v62  ;;  %v878_v23 = vshll.u32 %v1928_v49, 16 }
  0xf0   : > { %861 = vrot.lane.b32.xlu1 %v2396_v29, %s1998_s17 }
  0xf1   : > { %v692_v2 = vpop.permute.xlu0 %691  ;;  %v880_v61 = vrot.slane %v878_v23, 1 }
  0xf2   : > { %v694_v5 = vpop.permute.xlu1 %693  ;;  %v996_v34 = vsel %vm982_vm4, %v963_v33, %v692_v2 }
  0xf3   : > { %906 = vrot.lane.b32.xlu0 %v585_v37, %s1999_s26  ;;  %v998_v44 = vsel %vm982_vm4, %v965_v42, %v694_v5  ;;  %v914_v5 = vrot.slane %v1927_v32, 1 }
  0xf4   : > { %908 = vrot.lane.b32.xlu1 %v597_v4, %s1999_s26 }
  0xf5   : > { %v729_v8 = vpop.permute.xlu0 %728 }
  0xf6   : > { %v731_v13 = vpop.permute.xlu1 %730 }
  0xf7   : > { %941 = vrot.lane.b32.xlu0 %v675_v45, %s2000_s7  ;;  %v1031_v50 = vsel %vm1015_vm5, %v998_v44, %v731_v13  ;;  %v916_v13 = vsel %vm630_vm0, %v914_v5, %v915_v6 }
  0xf8   : > { %626 = vrot.lane.b32.xlu1 %v585_v37, %s1996_s13  ;;  %v1029_v37 = vsel %vm1015_vm5, %v996_v34, %v729_v8 }
  0xf9   : > { %v776_v16 = vpop.permute.xlu0 %775 }
  0xfa   : > { %v778_v19 = vpop.permute.xlu1 %777  ;;  %v1062_v14 = vsel %vm1048_vm6, %v1029_v37, %v776_v16 }
  0xfb   : > { %943 = vrot.lane.b32.xlu0 %v678_v15, %s2000_s7  ;;  %v1064_v52 = vsel %vm1048_vm6, %v1031_v50, %v778_v19 }
  0xfc   : > { %628 = vrot.lane.b32.xlu1 %v597_v4, %s1996_s13  ;;  %s1933_s13 = sshll.u32 %s2004_s22, 4  ;;  %s1934_s13 = int_to_ptr.vmem [resolvable:$false] %s1933_s13 }
  0xfd   : > { %v811_v20 = vpop.permute.xlu0 %810 }
  0xfe   : > { %v813_v25 = vpop.permute.xlu1 %812  ;;  %v1095_v43 = vsel %vm1081_vm7, %v1062_v14, %v811_v20 }
  0xff   : > { %707 = vrot.lane.b32.xlu0 %v675_v45, %s1995_s12  ;;  %v1097_v55 = vsel %vm1081_vm7, %v1064_v52, %v813_v25 }
 0x100   : > { %709 = vrot.lane.b32.xlu1 %v678_v15, %s1995_s12 }
 0x101   : > { %v848_v26 = vpop.permute.xlu0 %847 }
 0x102   : > { %v850_v1 = vpop.permute.xlu1 %849  ;;  %v1128_v45 = vsel %vm1114_vm8, %v1095_v43, %v848_v26 }
 0x103   : > { %744 = vrot.lane.b32.xlu0 %v2396_v29, %s1993_s10  ;;  %v1130_v56 = vsel %vm1114_vm8, %v1097_v55, %v850_v1 }
 0x104   : > { %746 = vrot.lane.b32.xlu1 %v2441_v12, %s1993_s10  ;;  %s2665_s10 = scalar_lea.hbm %s2712_s5, %s1749_s30 }
 0x105   : > { %v895_v0 = vpop.permute.xlu0 %894 }
 0x106   : > { %v897_v41 = vpop.permute.xlu1 %896  ;;  %v1161_v30 = vsel %vm1147_vm9, %v1128_v45, %v895_v0 }
 0x107   : > { %791 = vrot.lane.b32.xlu0 %v597_v4, %s1997_s14  ;;  %v1163_v57 = vsel %vm1147_vm9, %v1130_v56, %v897_v41  ;;  %v881_v4 = vsel %vm405_vm1, %v876_v59, %v880_v61 }
 0x108   : > { %793 = vrot.lane.b32.xlu1 %v762_v38, %s1997_s14  ;;  %s1935_s14 = scalar_lea.vmem %s1934_s13, 32 }
 0x109   : > { %v930_v60 = vpop.permute.xlu0 %929 }
 0x10a   : > { %v615_v53 = vpop.permute.xlu1 %614  ;;  %v1194_v54 = vsel %vm1180_vm10, %v1161_v30, %v930_v60 }
 0x10b   : > { %826 = vrot.lane.b32.xlu0 %v678_v15, %s1994_s11  ;;  %1794 = vmatprep.mubr.msk.bf16.mxu0 %vm1240_vm11, %v1194_v54  ;;  %v967_v21 = vsel %vm949_vm3, %v2229_v39, %v615_v53 }
 0x10c   : > { %828 = vrot.lane.b32.xlu1 %v797_v46, %s1994_s11  ;;  %s1620_s11 = scalar_lea.sflag [#allocation3], %s215_s23 }
 0x10d   : > { %v932_v58 = vpop.permute.xlu0 %931 }
 0x10e   : > { %v617_v62 = vpop.permute.xlu1 %616  ;;  %v1196_v63 = vsel %vm1180_vm10, %v1163_v57, %v932_v58 }
 0x10f   : > { %863 = vrot.lane.b32.xlu0 %v2441_v12, %s1998_s17  ;;  %1795 = vmatmul.mubr.msk.bf16.gmra.mrb[12].mxu0 %vm1240_vm11, %v1196_v63  ;;  %v969_v31 = vsel %vm949_vm3, %v2242_v48, %v617_v62 }
 0x110   : > { %865 = vrot.lane.b32.xlu1 %v1927_v32, %s1998_s17 }
 0x111   : > { %v696_v2 = vpop.permute.xlu0 %695 }
 0x112   : > { %v698_v7 = vpop.permute.xlu1 %697  ;;  %v1000_v22 = vsel %vm982_vm4, %v967_v21, %v696_v2 }
 0x113   : > { %910 = vrot.lane.b32.xlu0 %v762_v38, %s1999_s26  ;;  %v1002_v1 = vsel %vm982_vm4, %v969_v31, %v698_v7 }
 0x114   : > { %912 = vrot.lane.b32.xlu1 %v881_v4, %s1999_s26 }
 0x115   : > { %v733_v8 = vpop.permute.xlu0 %732 }
 0x116   : > { %v735_v15 = vpop.permute.xlu1 %734  ;;  %v1033_v24 = vsel %vm1015_vm5, %v1000_v22, %v733_v8 }
 0x117   : > { %945 = vrot.lane.b32.xlu0 %v797_v46, %s2000_s7  ;;  %v1035_v34 = vsel %vm1015_vm5, %v1002_v1, %v735_v15 }
 0x118   : > { %947 = vrot.lane.b32.xlu1 %v916_v13, %s2000_s7  ;;  %s1632_s7 = sshll.u32 %s216_s6, 4  ;;  %s2667_s7 = int_to_ptr.vmem [resolvable:$true] %s1632_s7 }
 0x119   : > { %v780_v12 = vpop.permute.xlu0 %779  ;;  %s1929_s12 = scalar_lea.vmem %s2667_s7, 16  ;;  %p1936_p0 = scmp.lt.s32.totalorder %s2667_s7, %s1934_s13 }
 0x11a   : > { %v782_v16 = vpop.permute.xlu1 %781  ;;  %v1066_v26 = vsel %vm1048_vm6, %v1033_v24, %v780_v12  ;;  %p1930_p11 = scmp.ne.s32.totalorder %s2667_s7, %s1929_s12  ;;  %p1937_p1 = scmp.lt.s32.totalorder %s1935_s14, %s1929_s12 }
 0x11b   : > { %v1068_v36 = vsel %vm1048_vm6, %v1035_v34, %v782_v16 }
 0x11c   : > { %p1931_p12 = pnand %p1930_p11, %p2073_p5  ;;  %p1938_p2 = por %p1937_p1, %p1936_p0 }
 0x11d   : > { %v815_v17 = vpop.permute.xlu0 %814 }
 0x11e   : > { %v817_v18 = vpop.permute.xlu1 %816  ;;  %v1099_v32 = vsel %vm1081_vm7, %v1066_v26, %v815_v17  ;;  %p1932_p13 = pneg %p1931_p12 }
 0x11f   : > { %v1101_v38 = vsel %vm1081_vm7, %v1068_v36, %v817_v18 }
 0x120   : > { %p1939_p3 = pnand %p1938_p2, %p1932_p13 }
 0x121   : > { %v852_v19 = vpop.permute.xlu0 %851 }
 0x122   : > { %v854_v20 = vpop.permute.xlu1 %853  ;;  %v1132_v33 = vsel %vm1114_vm8, %v1099_v32, %v852_v19 }
 0x123   : > { %v1134_v48 = vsel %vm1114_vm8, %v1101_v38, %v854_v20 }
 0x125   : > { %v899_v25 = vpop.permute.xlu0 %898 }
 0x126   : > { %v901_v3 = vpop.permute.xlu1 %900  ;;  %v1165_v39 = vsel %vm1147_vm9, %v1132_v33, %v899_v25 }
 0x127   : > { %v1167_v49 = vsel %vm1147_vm9, %v1134_v48, %v901_v3 }
 0x129   : > { %v934_v35 = vpop.permute.xlu0 %933 }
 0x12a   : > { %v619_v37 = vpop.permute.xlu1 %618  ;;  %v1198_v0 = vsel %vm1180_vm10, %v1165_v39, %v934_v35 }
 0x12b   : > { %1798 = vmatprep.mubr.msk.bf16.mxu0 %vm1240_vm11, %v1198_v0  ;;  %v971_v23 = vsel %vm949_vm3, %v2267_v9, %v619_v37 }
 0x12d   : > { %v936_v40 = vpop.permute.xlu0 %935 }
 0x12e   : > { %v621_v14 = vpop.permute.xlu1 %620  ;;  %v1200_v41 = vsel %vm1180_vm10, %v1167_v49, %v936_v40 }
 0x12f   : > { %1799 = vmatmul.mubr.msk.bf16.gmra.mrb[16].mxu0 %vm1240_vm11, %v1200_v41  ;;  %v973_v57 = vsel %vm949_vm3, %v2285_v28, %v621_v14 }
 0x131   : > { %v700_v42 = vpop.permute.xlu0 %699 }
 0x132   : > { %v702_v43 = vpop.permute.xlu1 %701  ;;  %v1004_v52 = vsel %vm982_vm4, %v971_v23, %v700_v42 }
 0x133   : > { %v1006_v59 = vsel %vm982_vm4, %v973_v57, %v702_v43 }
 0x135   : > { %v737_v44 = vpop.permute.xlu0 %736 }
 0x136   : > { %v739_v45 = vpop.permute.xlu1 %738  ;;  %v1037_v53 = vsel %vm1015_vm5, %v1004_v52, %v737_v44  ;;  %v2558_v52 = vld [vmem:[%s2709_s2] ss:$0 sm:$0xff] }
 0x137   : > { %v1039_v62 = vsel %vm1015_vm5, %v1006_v59, %v739_v45 }
 0x139   : > { %v784_v46 = vpop.permute.xlu0 %783 }
 0x13a   : > { %v786_v47 = vpop.permute.xlu1 %785  ;;  %v1070_v55 = vsel %vm1048_vm6, %v1037_v53, %v784_v46 }
 0x13b   : > { %v1072_v2 = vsel %vm1048_vm6, %v1039_v62, %v786_v47 }
 0x13d   : > { %v819_v50 = vpop.permute.xlu0 %818 }
 0x13e   : > { %v821_v30 = vpop.permute.xlu1 %820  ;;  %v1103_v58 = vsel %vm1081_vm7, %v1070_v55, %v819_v50 }
 0x13f   : > { %v1105_v6 = vsel %vm1081_vm7, %v1072_v2, %v821_v30 }
 0x141   : > { %v856_v60 = vpop.permute.xlu0 %855 }
 0x142   : > { %v858_v51 = vpop.permute.xlu1 %857  ;;  %v1136_v61 = vsel %vm1114_vm8, %v1103_v58, %v856_v60 }
 0x143   : > { %v1138_v28 = vsel %vm1114_vm8, %v1105_v6, %v858_v51 }
 0x145   : > { %v903_v54 = vpop.permute.xlu0 %902 }
 0x146   : > { %v905_v56 = vpop.permute.xlu1 %904  ;;  %v1169_v9 = vsel %vm1147_vm9, %v1136_v61, %v903_v54 }
 0x147   : > { %v1171_v7 = vsel %vm1147_vm9, %v1138_v28, %v905_v56 }
 0x149   : > { %v938_v63 = vpop.permute.xlu0 %937 }
 0x14a   : > { %v623_v4 = vpop.permute.xlu1 %622  ;;  %v1202_v5 = vsel %vm1180_vm10, %v1169_v9, %v938_v63 }
 0x14b   : > { %1802 = vmatprep.mubr.msk.bf16.mxu1 %vm1240_vm11, %v1202_v5  ;;  %v975_v26 = vsel %vm949_vm3, %v2325_v10, %v623_v4 }
 0x14d   : > { %v940_v8 = vpop.permute.xlu0 %939 }
 0x14e   : > { %v625_v13 = vpop.permute.xlu1 %624  ;;  %v1204_v15 = vsel %vm1180_vm10, %v1171_v7, %v940_v8 }
 0x14f   : > { %1803 = vmatmul.mubr.msk.bf16.vlgmr.msra.gmra.mrb[0].mxu1 %vm1240_vm11, %v1204_v15  ;;  %v977_v34 = vsel %vm949_vm3, %v2338_v27, %v625_v13 }
 0x151   : > { %v704_v12 = vpop.permute.xlu0 %703 }
 0x152   : > { %v706_v16 = vpop.permute.xlu1 %705  ;;  %v1008_v3 = vsel %vm982_vm4, %v975_v26, %v704_v12 }
 0x153   : > { %v1010_v35 = vsel %vm982_vm4, %v977_v34, %v706_v16 }
 0x155   : > { %v741_v17 = vpop.permute.xlu0 %740 }
 0x156   : > { %v743_v18 = vpop.permute.xlu1 %742  ;;  %v1041_v31 = vsel %vm1015_vm5, %v1008_v3, %v741_v17 }
 0x157   : > { %v1043_v37 = vsel %vm1015_vm5, %v1010_v35, %v743_v18 }
 0x159   : > { %v788_v19 = vpop.permute.xlu0 %787 }
 0x15a   : > { %v790_v20 = vpop.permute.xlu1 %789  ;;  %v1074_v1 = vsel %vm1048_vm6, %v1041_v31, %v788_v19 }
 0x15b   : > { %v1076_v38 = vsel %vm1048_vm6, %v1043_v37, %v790_v20 }
 0x15d   : > { %v823_v21 = vpop.permute.xlu0 %822 }
 0x15e   : > { %v825_v22 = vpop.permute.xlu1 %824  ;;  %v1107_v39 = vsel %vm1081_vm7, %v1074_v1, %v823_v21 }
 0x15f   : > { %v1109_v40 = vsel %vm1081_vm7, %v1076_v38, %v825_v22 }
 0x161   : > { %v860_v24 = vpop.permute.xlu0 %859 }
 0x162   : > { %v862_v25 = vpop.permute.xlu1 %861  ;;  %v1140_v36 = vsel %vm1114_vm8, %v1107_v39, %v860_v24 }
 0x163   : > { %v1142_v27 = vsel %vm1114_vm8, %v1109_v40, %v862_v25 }
 0x165   : > { %v907_v32 = vpop.permute.xlu0 %906 }
 0x166   : > { %v909_v33 = vpop.permute.xlu1 %908  ;;  %v1173_v10 = vsel %vm1147_vm9, %v1140_v36, %v907_v32 }
 0x167   : > { %v1175_v14 = vsel %vm1147_vm9, %v1142_v27, %v909_v33 }
 0x169   : > { %v942_v0 = vpop.permute.xlu0 %941 }
 0x16a   : > { %v627_v48 = vpop.permute.xlu1 %626  ;;  %v1206_v49 = vsel %vm1180_vm10, %v1173_v10, %v942_v0 }
 0x16b   : > { %1806 = vmatprep.mubr.msk.bf16.mxu1 %vm1240_vm11, %v1206_v49  ;;  %v979_v55 = vsel %vm949_vm3, %v2383_v11, %v627_v48 }
 0x16d   : > { %v944_v41 = vpop.permute.xlu0 %943 }
 0x16e   : > { %v629_v42 = vpop.permute.xlu1 %628  ;;  %v1208_v43 = vsel %vm1180_vm10, %v1175_v14, %v944_v41 }
 0x16f   : > { %1807 = vmatmul.mubr.msk.bf16.gmra.mrb[4].mxu1 %vm1240_vm11, %v1208_v43  ;;  %v981_v57 = vsel %vm949_vm3, %v2396_v29, %v629_v42 }
 0x171   : > { %v708_v44 = vpop.permute.xlu0 %707 }
 0x172   : > { %v710_v45 = vpop.permute.xlu1 %709  ;;  %v1012_v58 = vsel %vm982_vm4, %v979_v55, %v708_v44 }
 0x173   : > { %v1014_v9 = vsel %vm982_vm4, %v981_v57, %v710_v45 }
 0x175   : > { %v745_v46 = vpop.permute.xlu0 %744 }
 0x176   : > { %v747_v47 = vpop.permute.xlu1 %746  ;;  %v1045_v63 = vsel %vm1015_vm5, %v1012_v58, %v745_v46 }
 0x177   : > { %v1047_v11 = vsel %vm1015_vm5, %v1014_v9, %v747_v47 }
 0x179   : > { %v792_v50 = vpop.permute.xlu0 %791 }
 0x17a   : > { %v794_v30 = vpop.permute.xlu1 %793  ;;  %v1078_v6 = vsel %vm1048_vm6, %v1045_v63, %v792_v50 }
 0x17b   : > { %v1080_v8 = vsel %vm1048_vm6, %v1047_v11, %v794_v30 }
 0x17d   : > { %v827_v60 = vpop.permute.xlu0 %826 }
 0x17e   : > { %v829_v51 = vpop.permute.xlu1 %828  ;;  %v1111_v13 = vsel %vm1081_vm7, %v1078_v6, %v827_v60 }
 0x17f   : > { %v1113_v15 = vsel %vm1081_vm7, %v1080_v8, %v829_v51 }
 0x181   : > { %v864_v23 = vpop.permute.xlu0 %863 }
 0x182   : > { %v866_v53 = vpop.permute.xlu1 %865  ;;  %v1784_v54 = vpop.f32.mrb[0].mxu0  ;;  %v1144_v12 = vsel %vm1114_vm8, %v1111_v13, %v864_v23 }
 0x183   : > { %v1311_v56 = vpop.f32.mrb[1].mxu0  ;;  %v1320_v59 = vadd.f32 %v1784_v54, %v2558_v52  ;;  %v1146_v18 = vsel %vm1114_vm8, %v1113_v15, %v866_v53 }
 0x184   : > { %v1312_v61 = vadd.f32 %v2558_v52, %v1311_v56  ;;  %v1785_v62 = vpop.f32.mrb[2].mxu0 }
 0x185   : > { %v1323_v2 = vadd.f32 %v1785_v62, %v2558_v52  ;;  %v1314_v4 = vpop.f32.mrb[3].mxu0  ;;  %v911_v5 = vpop.permute.xlu0 %910  ;;  %v1440_v16 = vmax.f32 %v1320_v59, 0.0 }
 0x186   : > { %v1438_v29 = vmax.f32 %v1312_v61, 0.0  ;;  %v913_v28 = vpop.permute.xlu1 %912  ;;  %v1315_v7 = vadd.f32 %v2558_v52, %v1314_v4  ;;  %v1177_v20 = vsel %vm1147_vm9, %v1144_v12, %v911_v5 }
 0x187   : > { %v1441_v19 = vmax.f32 %v1323_v2, 0.0  ;;  %v1179_v24 = vsel %vm1147_vm9, %v1146_v18, %v913_v28  ;;  %v1473_v1 = vsel %vm1180_vm10, %v1440_v16, 0.0 }
 0x188   : > { %v1439_v17 = vmax.f32 %v1315_v7, 0.0  ;;  %v1470_v22 = vsel %vm1180_vm10, %v1438_v29, 0.0 }
 0x189   : > { %v946_v21 = vpop.permute.xlu0 %945  ;;  %v1475_v34 = vsel %vm1180_vm10, %v1441_v19, 0.0 }
 0x18a   : > { %v1471_v25 = vsel %vm1180_vm10, %v1439_v17, 0.0  ;;  %v948_v26 = vpop.permute.xlu1 %947  ;;  %v1210_v3 = vsel %vm1180_vm10, %v1177_v20, %v946_v21 }
 0x18b   : > { %v1472_v31 = vadd.f32 %v1471_v25, %v1470_v22  ;;  %v1212_v32 = vsel %vm1180_vm10, %v1179_v24, %v948_v26  ;;  %1810 = vmatprep.mubr.msk.bf16.mxu1 %vm1240_vm11, %v1210_v3 }
 0x18c   : > { %1811 = vmatmul.mubr.msk.bf16.gmra.mrb[8].mxu1 %vm1240_vm11, %v1212_v32 }
 0x18d   : > { %v1474_v33 = vadd.f32 %v1473_v1, %v1472_v31 }
 0x18f   : > { %v1476_v39 = vadd.f32 %v1475_v34, %v1474_v33  ;;  %v1540_v33 = vld [vmem:[%s2710_s3] sm:$0xff]  ;;  %v1541_v34 = vld [vmem:[%s2710_s3 + $0x8] sm:$0xff] }
 0x1a2   : > { %v1788_v35 = vpop.f32.mrb[4].mxu0 }
 0x1a3   : > { %v1327_v36 = vpop.f32.mrb[5].mxu0  ;;  %v1336_v37 = vadd.f32 %v1788_v35, %v2558_v52  ;;  %v2001_v35 = vmov 0.0|0.0  }
 0x1a4   : > { %v1328_v10 = vadd.f32 %v2558_v52, %v1327_v36  ;;  %v1789_v0 = vpop.f32.mrb[6].mxu0  ;;  %1825 = vmatprep.subr.bf16.mxu1 %v2001_v35  ;;  %v1542_v36 = vld [vmem:[%s2710_s3 + $0x10] sm:$0xff] }
 0x1a5   : > { %v1330_v38 = vpop.f32.mrb[7].mxu0  ;;  %v1339_v49 = vadd.f32 %v1789_v0, %v2558_v52  ;;  %v1444_v27 = vmax.f32 %v1336_v37, 0.0  ;;  %v1543_v37 = vld [vmem:[%s2710_s3 + $0x18] sm:$0xff]  ;;  %v2003_v0 = vmov 0.0  }
 0x1a6   : > { %v1442_v48 = vmax.f32 %v1328_v10, 0.0  ;;  %v1331_v40 = vadd.f32 %v2558_v52, %v1330_v38  ;;  %v1829_v10 = vpack.c.bf16 %v1543_v37, %v1542_v36  ;;  %1822 = vmatprep.mubr.msk.f32.mxu1 %vm2002_vm12, %v2003_v0 }
 0x1a7   : > { %v1445_v43 = vmax.f32 %v1339_v49, 0.0  ;;  %v1481_v46 = vsel %vm1180_vm10, %v1444_v27, 0.0 }
 0x1a8   : > { %v1477_v14 = vsel %vm1180_vm10, %v1442_v48, 0.0  ;;  %v1443_v41 = vmax.f32 %v1331_v40, 0.0 }
 0x1a9   : > { %v1478_v42 = vadd.f32 %v1477_v14, %v1476_v39  ;;  %v1483_v50 = vsel %vm1180_vm10, %v1445_v43, 0.0  ;;  %v1826_v39 = vpack.c.bf16 %v1541_v34, %v1540_v33 }
 0x1aa   : > { %v1479_v44 = vsel %vm1180_vm10, %v1443_v41, 0.0 }
 0x1ab   : > { %v1480_v45 = vadd.f32 %v1479_v44, %v1478_v42  ;;  %1827 = vmatpush3.bf16.msra.mxu1 %v1826_v39 }
 0x1ac   : > { %1828 = vmatprep.subr.bf16.mxu1 %v2001_v35 }
 0x1ad   : > { %v1482_v47 = vadd.f32 %v1481_v46, %v1480_v45 }
 0x1af   : > { %v1484_v30 = vadd.f32 %v1483_v50, %v1482_v47  ;;  %1830 = vmatpush3.bf16.msra.mxu1 %v1829_v10 }
 0x1c2   : > { %v1792_v60 = vpop.f32.mrb[8].mxu0 }
 0x1c3   : > { %v1343_v51 = vpop.f32.mrb[9].mxu0  ;;  %v1352_v23 = vadd.f32 %v1792_v60, %v2558_v52 }
 0x1c4   : > { %v1344_v53 = vadd.f32 %v2558_v52, %v1343_v51  ;;  %v1793_v54 = vpop.f32.mrb[10].mxu0 }
 0x1c5   : > { %v1346_v55 = vpop.f32.mrb[11].mxu0  ;;  %v1355_v57 = vadd.f32 %v1793_v54, %v2558_v52  ;;  %v1448_v59 = vmax.f32 %v1352_v23, 0.0 }
 0x1c6   : > { %v1446_v56 = vmax.f32 %v1344_v53, 0.0  ;;  %v1347_v58 = vadd.f32 %v2558_v52, %v1346_v55 }
 0x1c7   : > { %v1449_v63 = vmax.f32 %v1355_v57, 0.0  ;;  %v1489_v5 = vsel %vm1180_vm10, %v1448_v59, 0.0 }
 0x1c8   : > { %v1485_v61 = vsel %vm1180_vm10, %v1446_v56, 0.0  ;;  %v1447_v62 = vmax.f32 %v1347_v58, 0.0 }
 0x1c9   : > { %v1486_v9 = vadd.f32 %v1485_v61, %v1484_v30  ;;  %v1491_v6 = vsel %vm1180_vm10, %v1449_v63, 0.0 }
 0x1ca   : > { %v1487_v2 = vsel %vm1180_vm10, %v1447_v62, 0.0 }
 0x1cb   : > { %v1488_v4 = vadd.f32 %v1487_v2, %v1486_v9 }
 0x1cd   : > { %v1490_v11 = vadd.f32 %v1489_v5, %v1488_v4 }
 0x1cf   : > { %v1492_v29 = vadd.f32 %v1491_v6, %v1490_v11 }
 0x1e2   : > { %v1796_v28 = vpop.f32.mrb[12].mxu0 }
 0x1e3   : > { %v1359_v7 = vpop.f32.mrb[13].mxu0  ;;  %v1368_v8 = vadd.f32 %v1796_v28, %v2558_v52 }
 0x1e4   : > { %v1360_v13 = vadd.f32 %v2558_v52, %v1359_v7  ;;  %v1797_v15 = vpop.f32.mrb[14].mxu0 }
 0x1e5   : > { %v1362_v12 = vpop.f32.mrb[15].mxu0  ;;  %v1371_v17 = vadd.f32 %v1797_v15, %v2558_v52  ;;  %v1452_v19 = vmax.f32 %v1368_v8, 0.0 }
 0x1e6   : > { %v1450_v16 = vmax.f32 %v1360_v13, 0.0  ;;  %v1363_v18 = vadd.f32 %v2558_v52, %v1362_v12 }
 0x1e7   : > { %v1453_v24 = vmax.f32 %v1371_v17, 0.0  ;;  %v1497_v3 = vsel %vm1180_vm10, %v1452_v19, 0.0 }
 0x1e8   : > { %v1493_v20 = vsel %vm1180_vm10, %v1450_v16, 0.0  ;;  %v1451_v21 = vmax.f32 %v1363_v18, 0.0 }
 0x1e9   : > { %v1494_v22 = vadd.f32 %v1493_v20, %v1492_v29  ;;  %v1499_v32 = vsel %vm1180_vm10, %v1453_v24, 0.0 }
 0x1ea   : > { %v1495_v25 = vsel %vm1180_vm10, %v1451_v21, 0.0 }
 0x1eb   : > { %v1496_v26 = vadd.f32 %v1495_v25, %v1494_v22 }
 0x1ed   : > { %v1498_v31 = vadd.f32 %v1497_v3, %v1496_v26 }
 0x1ef   : > { %v1500_v1 = vadd.f32 %v1499_v32, %v1498_v31 }
 0x202   : > { %v1800_v38 = vpop.f32.mrb[16].mxu0 }
 0x203   : > { %v1375_v48 = vpop.f32.mrb[17].mxu0  ;;  %v1384_v49 = vadd.f32 %v1800_v38, %v2558_v52 }
 0x204   : > { %v1376_v40 = vadd.f32 %v2558_v52, %v1375_v48  ;;  %v1801_v27 = vpop.f32.mrb[18].mxu0 }
 0x205   : > { %v1378_v14 = vpop.f32.mrb[19].mxu0  ;;  %v1387_v42 = vadd.f32 %v1801_v27, %v2558_v52  ;;  %v1456_v44 = vmax.f32 %v1384_v49, 0.0 }
 0x206   : > { %v1454_v41 = vmax.f32 %v1376_v40, 0.0  ;;  %v1379_v43 = vadd.f32 %v2558_v52, %v1378_v14 }
 0x207   : > { %v1457_v50 = vmax.f32 %v1387_v42, 0.0  ;;  %v1505_v51 = vsel %vm1180_vm10, %v1456_v44, 0.0 }
 0x208   : > { %v1501_v45 = vsel %vm1180_vm10, %v1454_v41, 0.0  ;;  %v1455_v46 = vmax.f32 %v1379_v43, 0.0 }
 0x209   : > { %v1502_v47 = vadd.f32 %v1501_v45, %v1500_v1  ;;  %v1507_v53 = vsel %vm1180_vm10, %v1457_v50, 0.0 }
 0x20a   : > { %v1503_v30 = vsel %vm1180_vm10, %v1455_v46, 0.0 }
 0x20b   : > { %v1504_v60 = vadd.f32 %v1503_v30, %v1502_v47 }
 0x20d   : > { %v1506_v23 = vadd.f32 %v1505_v51, %v1504_v60 }
 0x20f   : > { %v1508_v54 = vadd.f32 %v1507_v53, %v1506_v23 }
 0x222   : > { %v1804_v55 = vpop.f32.mrb[0].mxu1 }
 0x223   : > { %v1391_v56 = vpop.f32.mrb[1].mxu1  ;;  %v1400_v57 = vadd.f32 %v1804_v55, %v2558_v52 }
 0x224   : > { %v1392_v58 = vadd.f32 %v2558_v52, %v1391_v56  ;;  %v1805_v59 = vpop.f32.mrb[2].mxu1 }
 0x225   : > { %v1394_v61 = vpop.f32.mrb[3].mxu1  ;;  %v1403_v9 = vadd.f32 %v1805_v59, %v2558_v52  ;;  %v1460_v2 = vmax.f32 %v1400_v57, 0.0 }
 0x226   : > { %v1458_v62 = vmax.f32 %v1392_v58, 0.0  ;;  %v1395_v63 = vadd.f32 %v2558_v52, %v1394_v61  ;;  %v1544_v58 = vld [vmem:[%s2711_s4] sm:$0x1] }
 0x227   : > { %v1461_v6 = vmax.f32 %v1403_v9, 0.0  ;;  %v1513_v7 = vsel %vm1180_vm10, %v1460_v2, 0.0 }
 0x228   : > { %v1509_v4 = vsel %vm1180_vm10, %v1458_v62, 0.0  ;;  %v1459_v5 = vmax.f32 %v1395_v63, 0.0 }
 0x229   : > { %v1510_v11 = vadd.f32 %v1509_v4, %v1508_v54  ;;  %v1515_v13 = vsel %vm1180_vm10, %v1461_v6, 0.0 }
 0x22a   : > { %v1511_v29 = vsel %vm1180_vm10, %v1459_v5, 0.0 }
 0x22b   : > { %v1512_v28 = vadd.f32 %v1511_v29, %v1510_v11 }
 0x22d   : > { %v1514_v8 = vadd.f32 %v1513_v7, %v1512_v28 }
 0x22f   : > { %v1516_v15 = vadd.f32 %v1515_v13, %v1514_v8 }
 0x242   : > { %v1808_v12 = vpop.f32.mrb[4].mxu1 }
 0x243   : > { %v1407_v16 = vpop.f32.mrb[5].mxu1  ;;  %v1416_v17 = vadd.f32 %v1808_v12, %v2558_v52 }
 0x244   : > { %v1408_v18 = vadd.f32 %v2558_v52, %v1407_v16  ;;  %v1809_v19 = vpop.f32.mrb[6].mxu1 }
 0x245   : > { %v1410_v20 = vpop.f32.mrb[7].mxu1  ;;  %v1419_v22 = vadd.f32 %v1809_v19, %v2558_v52  ;;  %v1464_v25 = vmax.f32 %v1416_v17, 0.0 }
 0x246   : > { %v1462_v21 = vmax.f32 %v1408_v18, 0.0  ;;  %v1411_v24 = vadd.f32 %v2558_v52, %v1410_v20 }
 0x247   : > { %v1465_v32 = vmax.f32 %v1419_v22, 0.0  ;;  %v1521_v34 = vsel %vm1180_vm10, %v1464_v25, 0.0 }
 0x248   : > { %v1517_v26 = vsel %vm1180_vm10, %v1462_v21, 0.0  ;;  %v1463_v3 = vmax.f32 %v1411_v24, 0.0 }
 0x249   : > { %v1518_v31 = vadd.f32 %v1517_v26, %v1516_v15  ;;  %v1523_v35 = vsel %vm1180_vm10, %v1465_v32, 0.0 }
 0x24a   : > { %v1519_v1 = vsel %vm1180_vm10, %v1463_v3, 0.0 }
 0x24b   : > { %v1520_v33 = vadd.f32 %v1519_v1, %v1518_v31 }
 0x24d   : > { %v1522_v39 = vadd.f32 %v1521_v34, %v1520_v33 }
 0x24f   : > { %v1524_v36 = vadd.f32 %v1523_v35, %v1522_v39 }
 0x25f   : > { %v1812_v37 = vpop.f32.mrb[8].mxu1 }
 0x260   : > { %v1423_v10 = vpop.f32.mrb[9].mxu1  ;;  %v1432_v0 = vadd.f32 %v1812_v37, %v2558_v52 }
 0x261   : > { %v1424_v38 = vadd.f32 %v2558_v52, %v1423_v10  ;;  %v1813_v48 = vpop.f32.mrb[10].mxu1 }
 0x262   : > { %v1426_v49 = vpop.f32.mrb[11].mxu1  ;;  %v1435_v27 = vadd.f32 %v1813_v48, %v2558_v52  ;;  %v1468_v41 = vmax.f32 %v1432_v0, 0.0 }
 0x263   : > { %v1466_v40 = vmax.f32 %v1424_v38, 0.0  ;;  %v1427_v14 = vadd.f32 %v2558_v52, %v1426_v49 }
 0x264   : > { %v1469_v45 = vmax.f32 %v1435_v27, 0.0  ;;  %v1529_v50 = vsel %vm1180_vm10, %v1468_v41, 0.0 }
 0x265   : > { %v1525_v42 = vsel %vm1180_vm10, %v1466_v40, 0.0  ;;  %v1467_v43 = vmax.f32 %v1427_v14, 0.0 }
 0x266   : > { %v1526_v44 = vadd.f32 %v1525_v42, %v1524_v36  ;;  %v1531_v60 = vsel %vm1180_vm10, %v1469_v45, 0.0 }
 0x267   : > { %v1527_v46 = vsel %vm1180_vm10, %v1467_v43, 0.0 }
 0x268   : > { %v1528_v47 = vadd.f32 %v1527_v46, %v1526_v44 }
 0x26a   : > { %v1530_v30 = vadd.f32 %v1529_v50, %v1528_v47 }
 0x26c   : > { %v1532_v51 = vadd.f32 %v1531_v60, %v1530_v30 }
 0x26e   : > { %v1533_v23 = vrot.slane %v1532_v51, 4 }
 0x270   : > { %v1534_v53 = vadd.f32 %v1533_v23, %v1532_v51 }
 0x272   : > { %v1535_v52 = vrot.slane %v1534_v53, 2 }
 0x274   : > { %v1536_v54 = vadd.f32 %v1535_v52, %v1534_v53 }
 0x276   : > { %v1537_v55 = vrot.slane %v1536_v54, 1 }
 0x278   : > { %v1538_v56 = vadd.f32 %v1537_v55, %v1536_v54 }
 0x27a   : > { %v1539_v57 = vmul.f32 0.00390625, %v1538_v56 }
 0x27c   : > { %1823 = vmatmul.mubr.msk.f32.vlgmr.msra.gmra.mrb[12].mxu1 %vm1180_vm10, %v1539_v57 }
 0x34f   : > { %v1614_v59 = vpop.f32.mrb[12].mxu1 }
 0x350   : > { %v1615_v61 = vadd.f32 %v1614_v59, %v1544_v58  ;;  %v1824_v62 = vpop.f32.mrb[13].mxu1 }
 0x352   : > { %1618 = vst [vmem:[%s216_s6] sm:$0x1] %v1615_v61 }
 0x353   : > { %1942 = shalt.err (!%p1939_p3)
}
 0x354   : > { %s1943_s15 = scalar_lea.hbm %s2665_s10, 16  ;;  %s1947_s23 = scalar_lea.hbm %s2712_s5, 32 }
 0x355   : > { %p1944_p4 = scmp.ne.s32.totalorder %s2665_s10, %s1943_s15  ;;  %p1948_p9 = scmp.lt.u32.totalorder %s2665_s10, %s2712_s5 }
 0x356   : > { %p1949_p10 = scmp.lt.u32.totalorder %s1947_s23, %s1943_s15  ;;  %p1951_p12 = scmp.lt.u32.totalorder %s1943_s15, %s2665_s10 }
 0x357   : > { %p1945_p7 = pnand %p1944_p4, %p2073_p5 }
 0x358   : > { %p1950_p11 = por %p1949_p10, %p1948_p9 }
 0x359   : > { %p1946_p8 = pneg %p1945_p7 }
 0x35a   : > { %p1952_p13 = por %p1951_p12, %p1950_p11 }
 0x35c   : > { %p1953_p0 = pnand %p1952_p13, %p1946_p8 }
 0x35e   : > { %1956 = shalt.err (!%p1953_p0)
}
 0x35f   : > { %1840 = dma.vmem_to_hbm [thread:$0]  (%p2073_p5), %s2667_s7, 16, %s2665_s10, %s1620_s11  }
 0x360 PF: > { %p1846_p1 = scmp.ge.s32.totalorder %s1991_s21, 2  ;;  %s1644_s30 = sand.u32 1, %s1979_s18  }
 0x361   : > { %s1645_s6 = scalar_lea.sflag [#allocation3], %s1644_s30 }
 0x362   : > { %p1843_p2 = pnand %p1846_p1, %p2077_p6 }
 0x364   : > { %1974 = dma.done.wait (!%p1843_p2), %s1645_s6, 16  }
 0x365   : > { %1976 = vsyncadd (!%p1843_p2), %s1645_s6, 4294967280  ;;  %p15_p3 = scmp.ge.s32.totalorder %s2060_s24, 4   ;;  %s2715_s18 = smov %s1983_s19 }
 0x366   : > { %s2716_s19 = smov %s1987_s20  ;;  %s2717_s20 = smov %s2071_s27 }
 0x367   : > { %s2718_s21 = smov %s2060_s24  ;;  %17 = sbr.rel (!%p15_p3) target bundleno = 3 (0x3), region = 75 }
 0x36e   :  { %1649 = vsyncpa [#allocation3], 1 }
 0x36f   :  { %1651 = vsyncpa [#allocation3 + $0x1], 1 }

</bundles_post_ra>
